<compile_context>
chip_gen: v7x
topology: tpu7x:2x2x1
jax: 0.10.0
libtpu: 0.0.40
codegen_flags: <defaults>
</compile_context>

<pallas_src>
import jax
import jax.numpy as jnp
from jax import lax
from jax.experimental import pallas as pl
from jax.experimental.pallas import tpu as pltpu

INIT_STD = 1.0   # std of initial proposal
Q_STD = 0.5      # transition noise std
R_STD = 0.4      # observation noise std


def _sis_kernel(obs_ref, noise_ref, a_ref, c_ref, segt_ref, out_ref):
    # Shapes inside the kernel (lane-dense layout):
    #   obs_ref   : (T1, E, B*N)  observation, pre-broadcast over each batch's particles
    #   noise_ref : (T1, D, B*N)  proposal noise
    #   a_ref     : (D, D)        transition matrix
    #   c_ref     : (E, D)        observation matrix
    #   segt_ref  : (B, B*N)      one-hot batch-membership rows
    #   out_ref   : (T1, B, D)    per-step filtering mean
    A = a_ref[...]
    C = c_ref[...]
    segt = segt_ref[...]
    n_batch, bn = segt.shape
    t_total = noise_ref.shape[0]

    neg_half_inv_var = -0.5 / (R_STD * R_STD)
    # additive mask: 0 on a batch's particle segment, -1e30 elsewhere (computed once)
    addmask = (segt - 1.0) * 1e30                                       # (B, B*N)

    def weight_and_aggregate(state, logw, obs):
        # --- observation log-likelihood (constant term dropped: cancels in softmax)
        pred = jnp.dot(C, state, preferred_element_type=jnp.float32)    # (E, B*N)
        resid = pred - obs                                              # (E, B*N)
        loglik = neg_half_inv_var * jnp.sum(resid * resid, axis=0,
                                            keepdims=True)              # (1, B*N)
        logw = logw + loglik

        # --- per-batch running renormalisation (subtract per-batch max, vectorised)
        masked = logw + addmask                                          # (B, B*N)
        m_b = jnp.max(masked, axis=1, keepdims=True)                     # (B, 1)
        m_bcast = jnp.sum(m_b * segt, axis=0, keepdims=True)             # (1, B*N)
        logw = logw - m_bcast                     # per-batch max is now 0
        w = jnp.exp(logw)                         # (1, B*N), in (0, 1]

        # --- aggregation_function == per-batch filtering mean (VPU/XLU only)
        wb = w * segt                                                    # (B, B*N)
        denom = jnp.sum(wb, axis=1, keepdims=True)                       # (B, 1)
        r = pl.reciprocal(denom, approx=True)                            # EUP slot
        r = r * (2.0 - denom * r)                                        # Newton x2
        r = r * (2.0 - denom * r)
        num = jnp.sum(state[None, :, :] * wb[:, None, :], axis=2)        # (B, D)
        mean_bd = num * r                                                # (B, D)
        return logw, mean_bd

    # ---- t == 0 : initial_proposal -------------------------------------------
    state0 = INIT_STD * noise_ref[0]                                     # (D, B*N)
    logw0 = jnp.zeros((1, bn), jnp.float32)
    logw0, mean0 = weight_and_aggregate(state0, logw0, obs_ref[0])
    out_ref[0] = mean0

    # ---- t > 0 : proposal kernel (bootstrap transition) -----------------------
    def body(t, carry):
        state, logw = carry
        state = (jnp.dot(A, state, preferred_element_type=jnp.float32)
                 + Q_STD * noise_ref[t])
        logw, mean_bd = weight_and_aggregate(state, logw, obs_ref[t])
        out_ref[t] = mean_bd
        return state, logw

    lax.fori_loop(1, t_total, body, (state0, logw0), unroll=True)


def sis_filter(observation, noise, A, C, *, n_particles, time_extent):
    """Run the SIS filter.  Returns (time_extent+1, B, D) float32 filtering means."""
    T1, B, E = observation.shape
    _, _, N, D = noise.shape
    assert T1 == time_extent + 1 and N == n_particles
    BN = B * N

    # Lane-dense re-layouts (pure layout plumbing, done once outside the kernel).
    noise_t = jnp.transpose(noise, (0, 3, 1, 2)).reshape(T1, D, BN)        # (T1, D, B*N)
    obs_bn = jnp.repeat(jnp.transpose(observation, (0, 2, 1)), N, axis=2)  # (T1, E, B*N)
    batch_of = jnp.arange(BN, dtype=jnp.int32) // N
    segt = (batch_of[None, :] ==
            jnp.arange(B, dtype=jnp.int32)[:, None]).astype(jnp.float32)   # (B, B*N)

    out = pl.pallas_call(
        _sis_kernel,
        out_shape=jax.ShapeDtypeStruct((T1, B, D), jnp.float32),
        grid=(1,),                                   # single invocation; time loop in-kernel
        in_specs=[
            pl.BlockSpec((T1, E, BN), lambda i: (0, 0, 0)),   # observations (broadcast)
            pl.BlockSpec((T1, D, BN), lambda i: (0, 0, 0)),   # proposal noise
            pl.BlockSpec((D, D), lambda i: (0, 0)),           # A
            pl.BlockSpec((E, D), lambda i: (0, 0)),           # C
            pl.BlockSpec((B, BN), lambda i: (0, 0)),          # batch segment one-hots
        ],
        out_specs=pl.BlockSpec((T1, B, D), lambda i: (0, 0, 0)),
        compiler_params=pltpu.CompilerParams(
            dimension_semantics=("arbitrary",)),
    )(obs_bn, noise_t, A, C, segt)

    return out                                       # (T1, B, D)


def sis_reference(observation, noise, A, C):
    """Pure-JAX reference of the same SIS forward pass."""
    T1, B, E = observation.shape
    _, _, N, D = noise.shape
    outs = []
    state = None
    logw = jnp.zeros((B, N), jnp.float32)
    for t in range(T1):
        if t == 0:
            state = INIT_STD * noise[0]
        else:
            state = jnp.einsum('bnd,ed->bne', state, A) + Q_STD * noise[t]
        pred = jnp.einsum('bnd,ed->bne', state, C)
        resid = pred - observation[t][:, None, :]
        loglik = (-0.5 * jnp.sum(resid * resid, axis=-1) / (R_STD * R_STD)
                  - 0.5 * E * jnp.log(2.0 * jnp.pi * R_STD * R_STD))
        logw = logw + loglik
        w = jax.nn.softmax(logw, axis=1)
        outs.append(jnp.sum(w[:, :, None] * state, axis=1))
    return jnp.stack(outs).astype(jnp.float32)


if __name__ == "__main__":
    # Small, SIS-consistent shapes.  B*N = 128 fills the lane axis exactly.
    time_extent = 7        # filter runs time_extent + 1 = 8 steps
    B = 2                  # batch of independent filters
    N = 64                 # particles per filter
    D = 8                  # latent state dim
    E = 4                  # observation dim
    T1 = time_extent + 1

    key = jax.random.PRNGKey(0)
    k_obs, k_noise = jax.random.split(key)

    # Deterministic model parameters (synthetic, not a checkpoint).
    A = (0.9 * jnp.eye(D, dtype=jnp.float32)
         + 0.01 * jnp.ones((D, D), jnp.float32))                  # transition matrix
    C = (jnp.eye(E, D, dtype=jnp.float32)
         + 0.05 * jnp.ones((E, D), jnp.float32))                  # observation matrix

    observation = 0.5 * jax.random.normal(k_obs, (T1, B, E), jnp.float32)
    noise = jax.random.normal(k_noise, (T1, B, N, D), jnp.float32)

    out = sis_filter(observation, noise, A, C,
                     n_particles=N, time_extent=time_extent)
    out = jax.block_until_ready(out)

    ref = jax.block_until_ready(sis_reference(observation, noise, A, C))
    assert out.shape == (T1, B, D) and out.dtype == jnp.float32
    err = jnp.max(jnp.abs(out - ref))
    assert jnp.allclose(out, ref, rtol=5e-4, atol=5e-4), \
        f"mismatch: max abs err {err}"

    print("KERNEL_OK")
</pallas_src>

<mosaic_0001>
module attributes {stable_mosaic.version = 11 : i64} {
  func.func @_sis_kernel(%arg0: i32, %arg1: memref<8x4x128xf32, #tpu.memory_space<vmem>>, %arg2: memref<8x8x128xf32, #tpu.memory_space<vmem>>, %arg3: memref<8x8xf32, #tpu.memory_space<vmem>>, %arg4: memref<4x8xf32, #tpu.memory_space<vmem>>, %arg5: memref<2x128xf32, #tpu.memory_space<vmem>>, %arg6: memref<8x2x8xf32, #tpu.memory_space<vmem>>) attributes {dimension_semantics = [#tpu.dimension_semantics<arbitrary>], iteration_bounds = array<i64: 1>, scalar_prefetch = 0 : i64, scratch_operands = 0 : i64, tpu.core_type = #tpu.core_type<tc>, window_params = [{pipeline_mode = #tpu.pipeline_mode<synchronous>, transform_indices = @transform_0, window_bounds = array<i64: 8, 4, 128>}, {pipeline_mode = #tpu.pipeline_mode<synchronous>, transform_indices = @transform_1, window_bounds = array<i64: 8, 8, 128>}, {pipeline_mode = #tpu.pipeline_mode<synchronous>, transform_indices = @transform_2, window_bounds = array<i64: 8, 8>}, {pipeline_mode = #tpu.pipeline_mode<synchronous>, transform_indices = @transform_3, window_bounds = array<i64: 4, 8>}, {pipeline_mode = #tpu.pipeline_mode<synchronous>, transform_indices = @transform_4, window_bounds = array<i64: 2, 128>}, {pipeline_mode = #tpu.pipeline_mode<synchronous>, transform_indices = @transform_5, window_bounds = array<i64: 8, 2, 8>}]} {
    %c0 = arith.constant 0 : index
    %c0_0 = arith.constant 0 : index
    %0 = vector.load %arg3[%c0, %c0_0] : memref<8x8xf32, #tpu.memory_space<vmem>>, vector<8x8xf32>
    %c0_1 = arith.constant 0 : index
    %c0_2 = arith.constant 0 : index
    %1 = vector.load %arg4[%c0_1, %c0_2] : memref<4x8xf32, #tpu.memory_space<vmem>>, vector<4x8xf32>
    %c0_3 = arith.constant 0 : index
    %c0_4 = arith.constant 0 : index
    %2 = vector.load %arg5[%c0_3, %c0_4] : memref<2x128xf32, #tpu.memory_space<vmem>>, vector<2x128xf32>
    %cst = arith.constant 1.000000e+00 : f32
    %3 = vector.broadcast %cst : f32 to vector<2x128xf32>
    %4 = arith.subf %2, %3 : vector<2x128xf32>
    %cst_5 = arith.constant 1.000000e+30 : f32
    %5 = vector.broadcast %cst_5 : f32 to vector<2x128xf32>
    %6 = arith.mulf %4, %5 : vector<2x128xf32>
    %c0_6 = arith.constant 0 : index
    %c0_7 = arith.constant 0 : index
    %c0_8 = arith.constant 0 : index
    %7 = vector.load %arg2[%c0_6, %c0_7, %c0_8] : memref<8x8x128xf32, #tpu.memory_space<vmem>>, vector<1x8x128xf32>
    %8 = vector.shape_cast %7 : vector<1x8x128xf32> to vector<8x128xf32>
    %cst_9 = arith.constant 1.000000e+00 : f32
    %9 = vector.broadcast %cst_9 : f32 to vector<8x128xf32>
    %10 = arith.mulf %9, %8 : vector<8x128xf32>
    %cst_10 = arith.constant 0.000000e+00 : f32
    %11 = vector.broadcast %cst_10 : f32 to vector<1x128xf32>
    %c0_11 = arith.constant 0 : index
    %c0_12 = arith.constant 0 : index
    %c0_13 = arith.constant 0 : index
    %12 = vector.load %arg1[%c0_11, %c0_12, %c0_13] : memref<8x4x128xf32, #tpu.memory_space<vmem>>, vector<1x4x128xf32>
    %13 = vector.shape_cast %12 : vector<1x4x128xf32> to vector<4x128xf32>
    %cst_14 = arith.constant dense<0.000000e+00> : vector<4x128xf32>
    %14 = tpu.matmul %1, %10, %cst_14 {dimension_numbers = #tpu.dot_dimension_numbers<[1], [0], [0], [1], [0, 0, 1, 1], [], []>} : vector<4x8xf32>, vector<8x128xf32>, vector<4x128xf32> -> vector<4x128xf32>
    %15 = arith.subf %14, %13 : vector<4x128xf32>
    %16 = arith.mulf %15, %15 : vector<4x128xf32>
    %cst_15 = arith.constant dense<0.000000e+00> : vector<128xf32>
    %17 = vector.multi_reduction <add>, %16, %cst_15 [0] : vector<4x128xf32> to vector<128xf32>
    %18 = vector.shape_cast %17 : vector<128xf32> to vector<1x128xf32>
    %cst_16 = arith.constant -3.125000e+00 : f32
    %19 = vector.broadcast %cst_16 : f32 to vector<1x128xf32>
    %20 = arith.mulf %19, %18 : vector<1x128xf32>
    %21 = arith.addf %11, %20 : vector<1x128xf32>
    %22 = vector.broadcast %21 : vector<1x128xf32> to vector<2x128xf32>
    %23 = arith.addf %22, %6 : vector<2x128xf32>
    %cst_17 = arith.constant dense<0xFF800000> : vector<2xf32>
    %24 = vector.multi_reduction <maximumf>, %23, %cst_17 [1] : vector<2x128xf32> to vector<2xf32>
    %25 = vector.shape_cast %24 : vector<2xf32> to vector<2x1xf32>
    %26 = vector.broadcast %25 : vector<2x1xf32> to vector<2x128xf32>
    %27 = arith.mulf %26, %2 : vector<2x128xf32>
    %cst_18 = arith.constant dense<0.000000e+00> : vector<128xf32>
    %28 = vector.multi_reduction <add>, %27, %cst_18 [0] : vector<2x128xf32> to vector<128xf32>
    %29 = vector.shape_cast %28 : vector<128xf32> to vector<1x128xf32>
    %30 = arith.subf %21, %29 : vector<1x128xf32>
    %31 = math.exp %30 : vector<1x128xf32>
    %32 = vector.broadcast %31 : vector<1x128xf32> to vector<2x128xf32>
    %33 = arith.mulf %32, %2 : vector<2x128xf32>
    %cst_19 = arith.constant dense<0.000000e+00> : vector<2xf32>
    %34 = vector.multi_reduction <add>, %33, %cst_19 [1] : vector<2x128xf32> to vector<2xf32>
    %35 = vector.shape_cast %34 : vector<2xf32> to vector<2x1xf32>
    %36 = tpu.reciprocal %35 {approx = true} : vector<2x1xf32> -> vector<2x1xf32>
    %37 = arith.mulf %35, %36 : vector<2x1xf32>
    %cst_20 = arith.constant 2.000000e+00 : f32
    %38 = vector.broadcast %cst_20 : f32 to vector<2x1xf32>
    %39 = arith.subf %38, %37 : vector<2x1xf32>
    %40 = arith.mulf %36, %39 : vector<2x1xf32>
    %41 = arith.mulf %35, %40 : vector<2x1xf32>
    %cst_21 = arith.constant 2.000000e+00 : f32
    %42 = vector.broadcast %cst_21 : f32 to vector<2x1xf32>
    %43 = arith.subf %42, %41 : vector<2x1xf32>
    %44 = arith.mulf %40, %43 : vector<2x1xf32>
    %45 = vector.shape_cast %10 : vector<8x128xf32> to vector<1x8x128xf32>
    %46 = vector.shape_cast %33 : vector<2x128xf32> to vector<2x1x128xf32>
    %47 = vector.broadcast %45 : vector<1x8x128xf32> to vector<2x8x128xf32>
    %48 = vector.broadcast %46 : vector<2x1x128xf32> to vector<2x8x128xf32>
    %49 = arith.mulf %47, %48 : vector<2x8x128xf32>
    %cst_22 = arith.constant dense<0.000000e+00> : vector<2x8xf32>
    %50 = vector.multi_reduction <add>, %49, %cst_22 [2] : vector<2x8x128xf32> to vector<2x8xf32>
    %51 = vector.broadcast %44 : vector<2x1xf32> to vector<2x8xf32>
    %52 = arith.mulf %50, %51 : vector<2x8xf32>
    %c0_23 = arith.constant 0 : index
    %c0_24 = arith.constant 0 : index
    %c0_25 = arith.constant 0 : index
    %53 = vector.load %arg6[%c0_23, %c0_24, %c0_25] : memref<8x2x8xf32, #tpu.memory_space<vmem>>, vector<1x2x8xf32>
    %54 = vector.shape_cast %53 : vector<1x2x8xf32> to vector<2x8xf32>
    %55 = vector.shape_cast %52 : vector<2x8xf32> to vector<1x2x8xf32>
    tpu.vector_store %arg6[%c0_23, %c0_24, %c0_25], %55 {strides = array<i32>} : memref<8x2x8xf32, #tpu.memory_space<vmem>>, vector<1x2x8xf32>,
    %c1_i32 = arith.constant 1 : i32
    %cst_26 = arith.constant dense<0.000000e+00> : vector<8x128xf32>
    %56 = tpu.matmul %0, %10, %cst_26 {dimension_numbers = #tpu.dot_dimension_numbers<[1], [0], [0], [1], [0, 0, 1, 1], [], []>} : vector<8x8xf32>, vector<8x128xf32>, vector<8x128xf32> -> vector<8x128xf32>
    %57 = arith.index_cast %c1_i32 : i32 to index
    %c0_27 = arith.constant 0 : index
    %c0_28 = arith.constant 0 : index
    %58 = vector.load %arg2[%57, %c0_27, %c0_28] : memref<8x8x128xf32, #tpu.memory_space<vmem>>, vector<1x8x128xf32>
    %59 = vector.shape_cast %58 : vector<1x8x128xf32> to vector<8x128xf32>
    %cst_29 = arith.constant 5.000000e-01 : f32
    %60 = vector.broadcast %cst_29 : f32 to vector<8x128xf32>
    %61 = arith.mulf %60, %59 : vector<8x128xf32>
    %62 = arith.addf %56, %61 : vector<8x128xf32>
    %63 = arith.index_cast %c1_i32 : i32 to index
    %c0_30 = arith.constant 0 : index
    %c0_31 = arith.constant 0 : index
    %64 = vector.load %arg1[%63, %c0_30, %c0_31] : memref<8x4x128xf32, #tpu.memory_space<vmem>>, vector<1x4x128xf32>
    %65 = vector.shape_cast %64 : vector<1x4x128xf32> to vector<4x128xf32>
    %cst_32 = arith.constant dense<0.000000e+00> : vector<4x128xf32>
    %66 = tpu.matmul %1, %62, %cst_32 {dimension_numbers = #tpu.dot_dimension_numbers<[1], [0], [0], [1], [0, 0, 1, 1], [], []>} : vector<4x8xf32>, vector<8x128xf32>, vector<4x128xf32> -> vector<4x128xf32>
    %67 = arith.subf %66, %65 : vector<4x128xf32>
    %68 = arith.mulf %67, %67 : vector<4x128xf32>
    %cst_33 = arith.constant dense<0.000000e+00> : vector<128xf32>
    %69 = vector.multi_reduction <add>, %68, %cst_33 [0] : vector<4x128xf32> to vector<128xf32>
    %70 = vector.shape_cast %69 : vector<128xf32> to vector<1x128xf32>
    %cst_34 = arith.constant -3.125000e+00 : f32
    %71 = vector.broadcast %cst_34 : f32 to vector<1x128xf32>
    %72 = arith.mulf %71, %70 : vector<1x128xf32>
    %73 = arith.addf %30, %72 : vector<1x128xf32>
    %74 = vector.broadcast %73 : vector<1x128xf32> to vector<2x128xf32>
    %75 = arith.addf %74, %6 : vector<2x128xf32>
    %cst_35 = arith.constant dense<0xFF800000> : vector<2xf32>
    %76 = vector.multi_reduction <maximumf>, %75, %cst_35 [1] : vector<2x128xf32> to vector<2xf32>
    %77 = vector.shape_cast %76 : vector<2xf32> to vector<2x1xf32>
    %78 = vector.broadcast %77 : vector<2x1xf32> to vector<2x128xf32>
    %79 = arith.mulf %78, %2 : vector<2x128xf32>
    %cst_36 = arith.constant dense<0.000000e+00> : vector<128xf32>
    %80 = vector.multi_reduction <add>, %79, %cst_36 [0] : vector<2x128xf32> to vector<128xf32>
    %81 = vector.shape_cast %80 : vector<128xf32> to vector<1x128xf32>
    %82 = arith.subf %73, %81 : vector<1x128xf32>
    %83 = math.exp %82 : vector<1x128xf32>
    %84 = vector.broadcast %83 : vector<1x128xf32> to vector<2x128xf32>
    %85 = arith.mulf %84, %2 : vector<2x128xf32>
    %cst_37 = arith.constant dense<0.000000e+00> : vector<2xf32>
    %86 = vector.multi_reduction <add>, %85, %cst_37 [1] : vector<2x128xf32> to vector<2xf32>
    %87 = vector.shape_cast %86 : vector<2xf32> to vector<2x1xf32>
    %88 = tpu.reciprocal %87 {approx = true} : vector<2x1xf32> -> vector<2x1xf32>
    %89 = arith.mulf %87, %88 : vector<2x1xf32>
    %cst_38 = arith.constant 2.000000e+00 : f32
    %90 = vector.broadcast %cst_38 : f32 to vector<2x1xf32>
    %91 = arith.subf %90, %89 : vector<2x1xf32>
    %92 = arith.mulf %88, %91 : vector<2x1xf32>
    %93 = arith.mulf %87, %92 : vector<2x1xf32>
    %cst_39 = arith.constant 2.000000e+00 : f32
    %94 = vector.broadcast %cst_39 : f32 to vector<2x1xf32>
    %95 = arith.subf %94, %93 : vector<2x1xf32>
    %96 = arith.mulf %92, %95 : vector<2x1xf32>
    %97 = vector.shape_cast %62 : vector<8x128xf32> to vector<1x8x128xf32>
    %98 = vector.shape_cast %85 : vector<2x128xf32> to vector<2x1x128xf32>
    %99 = vector.broadcast %97 : vector<1x8x128xf32> to vector<2x8x128xf32>
    %100 = vector.broadcast %98 : vector<2x1x128xf32> to vector<2x8x128xf32>
    %101 = arith.mulf %99, %100 : vector<2x8x128xf32>
    %cst_40 = arith.constant dense<0.000000e+00> : vector<2x8xf32>
    %102 = vector.multi_reduction <add>, %101, %cst_40 [2] : vector<2x8x128xf32> to vector<2x8xf32>
    %103 = vector.broadcast %96 : vector<2x1xf32> to vector<2x8xf32>
    %104 = arith.mulf %102, %103 : vector<2x8xf32>
    %105 = arith.index_cast %c1_i32 : i32 to index
    %c0_41 = arith.constant 0 : index
    %c0_42 = arith.constant 0 : index
    %106 = vector.load %arg6[%105, %c0_41, %c0_42] : memref<8x2x8xf32, #tpu.memory_space<vmem>>, vector<1x2x8xf32>
    %107 = vector.shape_cast %106 : vector<1x2x8xf32> to vector<2x8xf32>
    %108 = vector.shape_cast %104 : vector<2x8xf32> to vector<1x2x8xf32>
    tpu.vector_store %arg6[%105, %c0_41, %c0_42], %108 {strides = array<i32>} : memref<8x2x8xf32, #tpu.memory_space<vmem>>, vector<1x2x8xf32>,
    %c2_i32 = arith.constant 2 : i32
    %cst_43 = arith.constant dense<0.000000e+00> : vector<8x128xf32>
    %109 = tpu.matmul %0, %62, %cst_43 {dimension_numbers = #tpu.dot_dimension_numbers<[1], [0], [0], [1], [0, 0, 1, 1], [], []>} : vector<8x8xf32>, vector<8x128xf32>, vector<8x128xf32> -> vector<8x128xf32>
    %110 = arith.index_cast %c2_i32 : i32 to index
    %c0_44 = arith.constant 0 : index
    %c0_45 = arith.constant 0 : index
    %111 = vector.load %arg2[%110, %c0_44, %c0_45] : memref<8x8x128xf32, #tpu.memory_space<vmem>>, vector<1x8x128xf32>
    %112 = vector.shape_cast %111 : vector<1x8x128xf32> to vector<8x128xf32>
    %cst_46 = arith.constant 5.000000e-01 : f32
    %113 = vector.broadcast %cst_46 : f32 to vector<8x128xf32>
    %114 = arith.mulf %113, %112 : vector<8x128xf32>
    %115 = arith.addf %109, %114 : vector<8x128xf32>
    %116 = arith.index_cast %c2_i32 : i32 to index
    %c0_47 = arith.constant 0 : index
    %c0_48 = arith.constant 0 : index
    %117 = vector.load %arg1[%116, %c0_47, %c0_48] : memref<8x4x128xf32, #tpu.memory_space<vmem>>, vector<1x4x128xf32>
    %118 = vector.shape_cast %117 : vector<1x4x128xf32> to vector<4x128xf32>
    %cst_49 = arith.constant dense<0.000000e+00> : vector<4x128xf32>
    %119 = tpu.matmul %1, %115, %cst_49 {dimension_numbers = #tpu.dot_dimension_numbers<[1], [0], [0], [1], [0, 0, 1, 1], [], []>} : vector<4x8xf32>, vector<8x128xf32>, vector<4x128xf32> -> vector<4x128xf32>
    %120 = arith.subf %119, %118 : vector<4x128xf32>
    %121 = arith.mulf %120, %120 : vector<4x128xf32>
    %cst_50 = arith.constant dense<0.000000e+00> : vector<128xf32>
    %122 = vector.multi_reduction <add>, %121, %cst_50 [0] : vector<4x128xf32> to vector<128xf32>
    %123 = vector.shape_cast %122 : vector<128xf32> to vector<1x128xf32>
    %cst_51 = arith.constant -3.125000e+00 : f32
    %124 = vector.broadcast %cst_51 : f32 to vector<1x128xf32>
    %125 = arith.mulf %124, %123 : vector<1x128xf32>
    %126 = arith.addf %82, %125 : vector<1x128xf32>
    %127 = vector.broadcast %126 : vector<1x128xf32> to vector<2x128xf32>
    %128 = arith.addf %127, %6 : vector<2x128xf32>
    %cst_52 = arith.constant dense<0xFF800000> : vector<2xf32>
    %129 = vector.multi_reduction <maximumf>, %128, %cst_52 [1] : vector<2x128xf32> to vector<2xf32>
    %130 = vector.shape_cast %129 : vector<2xf32> to vector<2x1xf32>
    %131 = vector.broadcast %130 : vector<2x1xf32> to vector<2x128xf32>
    %132 = arith.mulf %131, %2 : vector<2x128xf32>
    %cst_53 = arith.constant dense<0.000000e+00> : vector<128xf32>
    %133 = vector.multi_reduction <add>, %132, %cst_53 [0] : vector<2x128xf32> to vector<128xf32>
    %134 = vector.shape_cast %133 : vector<128xf32> to vector<1x128xf32>
    %135 = arith.subf %126, %134 : vector<1x128xf32>
    %136 = math.exp %135 : vector<1x128xf32>
    %137 = vector.broadcast %136 : vector<1x128xf32> to vector<2x128xf32>
    %138 = arith.mulf %137, %2 : vector<2x128xf32>
    %cst_54 = arith.constant dense<0.000000e+00> : vector<2xf32>
    %139 = vector.multi_reduction <add>, %138, %cst_54 [1] : vector<2x128xf32> to vector<2xf32>
    %140 = vector.shape_cast %139 : vector<2xf32> to vector<2x1xf32>
    %141 = tpu.reciprocal %140 {approx = true} : vector<2x1xf32> -> vector<2x1xf32>
    %142 = arith.mulf %140, %141 : vector<2x1xf32>
    %cst_55 = arith.constant 2.000000e+00 : f32
    %143 = vector.broadcast %cst_55 : f32 to vector<2x1xf32>
    %144 = arith.subf %143, %142 : vector<2x1xf32>
    %145 = arith.mulf %141, %144 : vector<2x1xf32>
    %146 = arith.mulf %140, %145 : vector<2x1xf32>
    %cst_56 = arith.constant 2.000000e+00 : f32
    %147 = vector.broadcast %cst_56 : f32 to vector<2x1xf32>
    %148 = arith.subf %147, %146 : vector<2x1xf32>
    %149 = arith.mulf %145, %148 : vector<2x1xf32>
    %150 = vector.shape_cast %115 : vector<8x128xf32> to vector<1x8x128xf32>
    %151 = vector.shape_cast %138 : vector<2x128xf32> to vector<2x1x128xf32>
    %152 = vector.broadcast %150 : vector<1x8x128xf32> to vector<2x8x128xf32>
    %153 = vector.broadcast %151 : vector<2x1x128xf32> to vector<2x8x128xf32>
    %154 = arith.mulf %152, %153 : vector<2x8x128xf32>
    %cst_57 = arith.constant dense<0.000000e+00> : vector<2x8xf32>
    %155 = vector.multi_reduction <add>, %154, %cst_57 [2] : vector<2x8x128xf32> to vector<2x8xf32>
    %156 = vector.broadcast %149 : vector<2x1xf32> to vector<2x8xf32>
    %157 = arith.mulf %155, %156 : vector<2x8xf32>
    %158 = arith.index_cast %c2_i32 : i32 to index
    %c0_58 = arith.constant 0 : index
    %c0_59 = arith.constant 0 : index
    %159 = vector.load %arg6[%158, %c0_58, %c0_59] : memref<8x2x8xf32, #tpu.memory_space<vmem>>, vector<1x2x8xf32>
    %160 = vector.shape_cast %159 : vector<1x2x8xf32> to vector<2x8xf32>
    %161 = vector.shape_cast %157 : vector<2x8xf32> to vector<1x2x8xf32>
    tpu.vector_store %arg6[%158, %c0_58, %c0_59], %161 {strides = array<i32>} : memref<8x2x8xf32, #tpu.memory_space<vmem>>, vector<1x2x8xf32>,
    %c3_i32 = arith.constant 3 : i32
    %cst_60 = arith.constant dense<0.000000e+00> : vector<8x128xf32>
    %162 = tpu.matmul %0, %115, %cst_60 {dimension_numbers = #tpu.dot_dimension_numbers<[1], [0], [0], [1], [0, 0, 1, 1], [], []>} : vector<8x8xf32>, vector<8x128xf32>, vector<8x128xf32> -> vector<8x128xf32>
    %163 = arith.index_cast %c3_i32 : i32 to index
    %c0_61 = arith.constant 0 : index
    %c0_62 = arith.constant 0 : index
    %164 = vector.load %arg2[%163, %c0_61, %c0_62] : memref<8x8x128xf32, #tpu.memory_space<vmem>>, vector<1x8x128xf32>
    %165 = vector.shape_cast %164 : vector<1x8x128xf32> to vector<8x128xf32>
    %cst_63 = arith.constant 5.000000e-01 : f32
    %166 = vector.broadcast %cst_63 : f32 to vector<8x128xf32>
    %167 = arith.mulf %166, %165 : vector<8x128xf32>
    %168 = arith.addf %162, %167 : vector<8x128xf32>
    %169 = arith.index_cast %c3_i32 : i32 to index
    %c0_64 = arith.constant 0 : index
    %c0_65 = arith.constant 0 : index
    %170 = vector.load %arg1[%169, %c0_64, %c0_65] : memref<8x4x128xf32, #tpu.memory_space<vmem>>, vector<1x4x128xf32>
    %171 = vector.shape_cast %170 : vector<1x4x128xf32> to vector<4x128xf32>
    %cst_66 = arith.constant dense<0.000000e+00> : vector<4x128xf32>
    %172 = tpu.matmul %1, %168, %cst_66 {dimension_numbers = #tpu.dot_dimension_numbers<[1], [0], [0], [1], [0, 0, 1, 1], [], []>} : vector<4x8xf32>, vector<8x128xf32>, vector<4x128xf32> -> vector<4x128xf32>
    %173 = arith.subf %172, %171 : vector<4x128xf32>
    %174 = arith.mulf %173, %173 : vector<4x128xf32>
    %cst_67 = arith.constant dense<0.000000e+00> : vector<128xf32>
    %175 = vector.multi_reduction <add>, %174, %cst_67 [0] : vector<4x128xf32> to vector<128xf32>
    %176 = vector.shape_cast %175 : vector<128xf32> to vector<1x128xf32>
    %cst_68 = arith.constant -3.125000e+00 : f32
    %177 = vector.broadcast %cst_68 : f32 to vector<1x128xf32>
    %178 = arith.mulf %177, %176 : vector<1x128xf32>
    %179 = arith.addf %135, %178 : vector<1x128xf32>
    %180 = vector.broadcast %179 : vector<1x128xf32> to vector<2x128xf32>
    %181 = arith.addf %180, %6 : vector<2x128xf32>
    %cst_69 = arith.constant dense<0xFF800000> : vector<2xf32>
    %182 = vector.multi_reduction <maximumf>, %181, %cst_69 [1] : vector<2x128xf32> to vector<2xf32>
    %183 = vector.shape_cast %182 : vector<2xf32> to vector<2x1xf32>
    %184 = vector.broadcast %183 : vector<2x1xf32> to vector<2x128xf32>
    %185 = arith.mulf %184, %2 : vector<2x128xf32>
    %cst_70 = arith.constant dense<0.000000e+00> : vector<128xf32>
    %186 = vector.multi_reduction <add>, %185, %cst_70 [0] : vector<2x128xf32> to vector<128xf32>
    %187 = vector.shape_cast %186 : vector<128xf32> to vector<1x128xf32>
    %188 = arith.subf %179, %187 : vector<1x128xf32>
    %189 = math.exp %188 : vector<1x128xf32>
    %190 = vector.broadcast %189 : vector<1x128xf32> to vector<2x128xf32>
    %191 = arith.mulf %190, %2 : vector<2x128xf32>
    %cst_71 = arith.constant dense<0.000000e+00> : vector<2xf32>
    %192 = vector.multi_reduction <add>, %191, %cst_71 [1] : vector<2x128xf32> to vector<2xf32>
    %193 = vector.shape_cast %192 : vector<2xf32> to vector<2x1xf32>
    %194 = tpu.reciprocal %193 {approx = true} : vector<2x1xf32> -> vector<2x1xf32>
    %195 = arith.mulf %193, %194 : vector<2x1xf32>
    %cst_72 = arith.constant 2.000000e+00 : f32
    %196 = vector.broadcast %cst_72 : f32 to vector<2x1xf32>
    %197 = arith.subf %196, %195 : vector<2x1xf32>
    %198 = arith.mulf %194, %197 : vector<2x1xf32>
    %199 = arith.mulf %193, %198 : vector<2x1xf32>
    %cst_73 = arith.constant 2.000000e+00 : f32
    %200 = vector.broadcast %cst_73 : f32 to vector<2x1xf32>
    %201 = arith.subf %200, %199 : vector<2x1xf32>
    %202 = arith.mulf %198, %201 : vector<2x1xf32>
    %203 = vector.shape_cast %168 : vector<8x128xf32> to vector<1x8x128xf32>
    %204 = vector.shape_cast %191 : vector<2x128xf32> to vector<2x1x128xf32>
    %205 = vector.broadcast %203 : vector<1x8x128xf32> to vector<2x8x128xf32>
    %206 = vector.broadcast %204 : vector<2x1x128xf32> to vector<2x8x128xf32>
    %207 = arith.mulf %205, %206 : vector<2x8x128xf32>
    %cst_74 = arith.constant dense<0.000000e+00> : vector<2x8xf32>
    %208 = vector.multi_reduction <add>, %207, %cst_74 [2] : vector<2x8x128xf32> to vector<2x8xf32>
    %209 = vector.broadcast %202 : vector<2x1xf32> to vector<2x8xf32>
    %210 = arith.mulf %208, %209 : vector<2x8xf32>
    %211 = arith.index_cast %c3_i32 : i32 to index
    %c0_75 = arith.constant 0 : index
    %c0_76 = arith.constant 0 : index
    %212 = vector.load %arg6[%211, %c0_75, %c0_76] : memref<8x2x8xf32, #tpu.memory_space<vmem>>, vector<1x2x8xf32>
    %213 = vector.shape_cast %212 : vector<1x2x8xf32> to vector<2x8xf32>
    %214 = vector.shape_cast %210 : vector<2x8xf32> to vector<1x2x8xf32>
    tpu.vector_store %arg6[%211, %c0_75, %c0_76], %214 {strides = array<i32>} : memref<8x2x8xf32, #tpu.memory_space<vmem>>, vector<1x2x8xf32>,
    %c4_i32 = arith.constant 4 : i32
    %cst_77 = arith.constant dense<0.000000e+00> : vector<8x128xf32>
    %215 = tpu.matmul %0, %168, %cst_77 {dimension_numbers = #tpu.dot_dimension_numbers<[1], [0], [0], [1], [0, 0, 1, 1], [], []>} : vector<8x8xf32>, vector<8x128xf32>, vector<8x128xf32> -> vector<8x128xf32>
    %216 = arith.index_cast %c4_i32 : i32 to index
    %c0_78 = arith.constant 0 : index
    %c0_79 = arith.constant 0 : index
    %217 = vector.load %arg2[%216, %c0_78, %c0_79] : memref<8x8x128xf32, #tpu.memory_space<vmem>>, vector<1x8x128xf32>
    %218 = vector.shape_cast %217 : vector<1x8x128xf32> to vector<8x128xf32>
    %cst_80 = arith.constant 5.000000e-01 : f32
    %219 = vector.broadcast %cst_80 : f32 to vector<8x128xf32>
    %220 = arith.mulf %219, %218 : vector<8x128xf32>
    %221 = arith.addf %215, %220 : vector<8x128xf32>
    %222 = arith.index_cast %c4_i32 : i32 to index
    %c0_81 = arith.constant 0 : index
    %c0_82 = arith.constant 0 : index
    %223 = vector.load %arg1[%222, %c0_81, %c0_82] : memref<8x4x128xf32, #tpu.memory_space<vmem>>, vector<1x4x128xf32>
    %224 = vector.shape_cast %223 : vector<1x4x128xf32> to vector<4x128xf32>
    %cst_83 = arith.constant dense<0.000000e+00> : vector<4x128xf32>
    %225 = tpu.matmul %1, %221, %cst_83 {dimension_numbers = #tpu.dot_dimension_numbers<[1], [0], [0], [1], [0, 0, 1, 1], [], []>} : vector<4x8xf32>, vector<8x128xf32>, vector<4x128xf32> -> vector<4x128xf32>
    %226 = arith.subf %225, %224 : vector<4x128xf32>
    %227 = arith.mulf %226, %226 : vector<4x128xf32>
    %cst_84 = arith.constant dense<0.000000e+00> : vector<128xf32>
    %228 = vector.multi_reduction <add>, %227, %cst_84 [0] : vector<4x128xf32> to vector<128xf32>
    %229 = vector.shape_cast %228 : vector<128xf32> to vector<1x128xf32>
    %cst_85 = arith.constant -3.125000e+00 : f32
    %230 = vector.broadcast %cst_85 : f32 to vector<1x128xf32>
    %231 = arith.mulf %230, %229 : vector<1x128xf32>
    %232 = arith.addf %188, %231 : vector<1x128xf32>
    %233 = vector.broadcast %232 : vector<1x128xf32> to vector<2x128xf32>
    %234 = arith.addf %233, %6 : vector<2x128xf32>
    %cst_86 = arith.constant dense<0xFF800000> : vector<2xf32>
    %235 = vector.multi_reduction <maximumf>, %234, %cst_86 [1] : vector<2x128xf32> to vector<2xf32>
    %236 = vector.shape_cast %235 : vector<2xf32> to vector<2x1xf32>
    %237 = vector.broadcast %236 : vector<2x1xf32> to vector<2x128xf32>
    %238 = arith.mulf %237, %2 : vector<2x128xf32>
    %cst_87 = arith.constant dense<0.000000e+00> : vector<128xf32>
    %239 = vector.multi_reduction <add>, %238, %cst_87 [0] : vector<2x128xf32> to vector<128xf32>
    %240 = vector.shape_cast %239 : vector<128xf32> to vector<1x128xf32>
    %241 = arith.subf %232, %240 : vector<1x128xf32>
    %242 = math.exp %241 : vector<1x128xf32>
    %243 = vector.broadcast %242 : vector<1x128xf32> to vector<2x128xf32>
    %244 = arith.mulf %243, %2 : vector<2x128xf32>
    %cst_88 = arith.constant dense<0.000000e+00> : vector<2xf32>
    %245 = vector.multi_reduction <add>, %244, %cst_88 [1] : vector<2x128xf32> to vector<2xf32>
    %246 = vector.shape_cast %245 : vector<2xf32> to vector<2x1xf32>
    %247 = tpu.reciprocal %246 {approx = true} : vector<2x1xf32> -> vector<2x1xf32>
    %248 = arith.mulf %246, %247 : vector<2x1xf32>
    %cst_89 = arith.constant 2.000000e+00 : f32
    %249 = vector.broadcast %cst_89 : f32 to vector<2x1xf32>
    %250 = arith.subf %249, %248 : vector<2x1xf32>
    %251 = arith.mulf %247, %250 : vector<2x1xf32>
    %252 = arith.mulf %246, %251 : vector<2x1xf32>
    %cst_90 = arith.constant 2.000000e+00 : f32
    %253 = vector.broadcast %cst_90 : f32 to vector<2x1xf32>
    %254 = arith.subf %253, %252 : vector<2x1xf32>
    %255 = arith.mulf %251, %254 : vector<2x1xf32>
    %256 = vector.shape_cast %221 : vector<8x128xf32> to vector<1x8x128xf32>
    %257 = vector.shape_cast %244 : vector<2x128xf32> to vector<2x1x128xf32>
    %258 = vector.broadcast %256 : vector<1x8x128xf32> to vector<2x8x128xf32>
    %259 = vector.broadcast %257 : vector<2x1x128xf32> to vector<2x8x128xf32>
    %260 = arith.mulf %258, %259 : vector<2x8x128xf32>
    %cst_91 = arith.constant dense<0.000000e+00> : vector<2x8xf32>
    %261 = vector.multi_reduction <add>, %260, %cst_91 [2] : vector<2x8x128xf32> to vector<2x8xf32>
    %262 = vector.broadcast %255 : vector<2x1xf32> to vector<2x8xf32>
    %263 = arith.mulf %261, %262 : vector<2x8xf32>
    %264 = arith.index_cast %c4_i32 : i32 to index
    %c0_92 = arith.constant 0 : index
    %c0_93 = arith.constant 0 : index
    %265 = vector.load %arg6[%264, %c0_92, %c0_93] : memref<8x2x8xf32, #tpu.memory_space<vmem>>, vector<1x2x8xf32>
    %266 = vector.shape_cast %265 : vector<1x2x8xf32> to vector<2x8xf32>
    %267 = vector.shape_cast %263 : vector<2x8xf32> to vector<1x2x8xf32>
    tpu.vector_store %arg6[%264, %c0_92, %c0_93], %267 {strides = array<i32>} : memref<8x2x8xf32, #tpu.memory_space<vmem>>, vector<1x2x8xf32>,
    %c5_i32 = arith.constant 5 : i32
    %cst_94 = arith.constant dense<0.000000e+00> : vector<8x128xf32>
    %268 = tpu.matmul %0, %221, %cst_94 {dimension_numbers = #tpu.dot_dimension_numbers<[1], [0], [0], [1], [0, 0, 1, 1], [], []>} : vector<8x8xf32>, vector<8x128xf32>, vector<8x128xf32> -> vector<8x128xf32>
    %269 = arith.index_cast %c5_i32 : i32 to index
    %c0_95 = arith.constant 0 : index
    %c0_96 = arith.constant 0 : index
    %270 = vector.load %arg2[%269, %c0_95, %c0_96] : memref<8x8x128xf32, #tpu.memory_space<vmem>>, vector<1x8x128xf32>
    %271 = vector.shape_cast %270 : vector<1x8x128xf32> to vector<8x128xf32>
    %cst_97 = arith.constant 5.000000e-01 : f32
    %272 = vector.broadcast %cst_97 : f32 to vector<8x128xf32>
    %273 = arith.mulf %272, %271 : vector<8x128xf32>
    %274 = arith.addf %268, %273 : vector<8x128xf32>
    %275 = arith.index_cast %c5_i32 : i32 to index
    %c0_98 = arith.constant 0 : index
    %c0_99 = arith.constant 0 : index
    %276 = vector.load %arg1[%275, %c0_98, %c0_99] : memref<8x4x128xf32, #tpu.memory_space<vmem>>, vector<1x4x128xf32>
    %277 = vector.shape_cast %276 : vector<1x4x128xf32> to vector<4x128xf32>
    %cst_100 = arith.constant dense<0.000000e+00> : vector<4x128xf32>
    %278 = tpu.matmul %1, %274, %cst_100 {dimension_numbers = #tpu.dot_dimension_numbers<[1], [0], [0], [1], [0, 0, 1, 1], [], []>} : vector<4x8xf32>, vector<8x128xf32>, vector<4x128xf32> -> vector<4x128xf32>
    %279 = arith.subf %278, %277 : vector<4x128xf32>
    %280 = arith.mulf %279, %279 : vector<4x128xf32>
    %cst_101 = arith.constant dense<0.000000e+00> : vector<128xf32>
    %281 = vector.multi_reduction <add>, %280, %cst_101 [0] : vector<4x128xf32> to vector<128xf32>
    %282 = vector.shape_cast %281 : vector<128xf32> to vector<1x128xf32>
    %cst_102 = arith.constant -3.125000e+00 : f32
    %283 = vector.broadcast %cst_102 : f32 to vector<1x128xf32>
    %284 = arith.mulf %283, %282 : vector<1x128xf32>
    %285 = arith.addf %241, %284 : vector<1x128xf32>
    %286 = vector.broadcast %285 : vector<1x128xf32> to vector<2x128xf32>
    %287 = arith.addf %286, %6 : vector<2x128xf32>
    %cst_103 = arith.constant dense<0xFF800000> : vector<2xf32>
    %288 = vector.multi_reduction <maximumf>, %287, %cst_103 [1] : vector<2x128xf32> to vector<2xf32>
    %289 = vector.shape_cast %288 : vector<2xf32> to vector<2x1xf32>
    %290 = vector.broadcast %289 : vector<2x1xf32> to vector<2x128xf32>
    %291 = arith.mulf %290, %2 : vector<2x128xf32>
    %cst_104 = arith.constant dense<0.000000e+00> : vector<128xf32>
    %292 = vector.multi_reduction <add>, %291, %cst_104 [0] : vector<2x128xf32> to vector<128xf32>
    %293 = vector.shape_cast %292 : vector<128xf32> to vector<1x128xf32>
    %294 = arith.subf %285, %293 : vector<1x128xf32>
    %295 = math.exp %294 : vector<1x128xf32>
    %296 = vector.broadcast %295 : vector<1x128xf32> to vector<2x128xf32>
    %297 = arith.mulf %296, %2 : vector<2x128xf32>
    %cst_105 = arith.constant dense<0.000000e+00> : vector<2xf32>
    %298 = vector.multi_reduction <add>, %297, %cst_105 [1] : vector<2x128xf32> to vector<2xf32>
    %299 = vector.shape_cast %298 : vector<2xf32> to vector<2x1xf32>
    %300 = tpu.reciprocal %299 {approx = true} : vector<2x1xf32> -> vector<2x1xf32>
    %301 = arith.mulf %299, %300 : vector<2x1xf32>
    %cst_106 = arith.constant 2.000000e+00 : f32
    %302 = vector.broadcast %cst_106 : f32 to vector<2x1xf32>
    %303 = arith.subf %302, %301 : vector<2x1xf32>
    %304 = arith.mulf %300, %303 : vector<2x1xf32>
    %305 = arith.mulf %299, %304 : vector<2x1xf32>
    %cst_107 = arith.constant 2.000000e+00 : f32
    %306 = vector.broadcast %cst_107 : f32 to vector<2x1xf32>
    %307 = arith.subf %306, %305 : vector<2x1xf32>
    %308 = arith.mulf %304, %307 : vector<2x1xf32>
    %309 = vector.shape_cast %274 : vector<8x128xf32> to vector<1x8x128xf32>
    %310 = vector.shape_cast %297 : vector<2x128xf32> to vector<2x1x128xf32>
    %311 = vector.broadcast %309 : vector<1x8x128xf32> to vector<2x8x128xf32>
    %312 = vector.broadcast %310 : vector<2x1x128xf32> to vector<2x8x128xf32>
    %313 = arith.mulf %311, %312 : vector<2x8x128xf32>
    %cst_108 = arith.constant dense<0.000000e+00> : vector<2x8xf32>
    %314 = vector.multi_reduction <add>, %313, %cst_108 [2] : vector<2x8x128xf32> to vector<2x8xf32>
    %315 = vector.broadcast %308 : vector<2x1xf32> to vector<2x8xf32>
    %316 = arith.mulf %314, %315 : vector<2x8xf32>
    %317 = arith.index_cast %c5_i32 : i32 to index
    %c0_109 = arith.constant 0 : index
    %c0_110 = arith.constant 0 : index
    %318 = vector.load %arg6[%317, %c0_109, %c0_110] : memref<8x2x8xf32, #tpu.memory_space<vmem>>, vector<1x2x8xf32>
    %319 = vector.shape_cast %318 : vector<1x2x8xf32> to vector<2x8xf32>
    %320 = vector.shape_cast %316 : vector<2x8xf32> to vector<1x2x8xf32>
    tpu.vector_store %arg6[%317, %c0_109, %c0_110], %320 {strides = array<i32>} : memref<8x2x8xf32, #tpu.memory_space<vmem>>, vector<1x2x8xf32>,
    %c6_i32 = arith.constant 6 : i32
    %cst_111 = arith.constant dense<0.000000e+00> : vector<8x128xf32>
    %321 = tpu.matmul %0, %274, %cst_111 {dimension_numbers = #tpu.dot_dimension_numbers<[1], [0], [0], [1], [0, 0, 1, 1], [], []>} : vector<8x8xf32>, vector<8x128xf32>, vector<8x128xf32> -> vector<8x128xf32>
    %322 = arith.index_cast %c6_i32 : i32 to index
    %c0_112 = arith.constant 0 : index
    %c0_113 = arith.constant 0 : index
    %323 = vector.load %arg2[%322, %c0_112, %c0_113] : memref<8x8x128xf32, #tpu.memory_space<vmem>>, vector<1x8x128xf32>
    %324 = vector.shape_cast %323 : vector<1x8x128xf32> to vector<8x128xf32>
    %cst_114 = arith.constant 5.000000e-01 : f32
    %325 = vector.broadcast %cst_114 : f32 to vector<8x128xf32>
    %326 = arith.mulf %325, %324 : vector<8x128xf32>
    %327 = arith.addf %321, %326 : vector<8x128xf32>
    %328 = arith.index_cast %c6_i32 : i32 to index
    %c0_115 = arith.constant 0 : index
    %c0_116 = arith.constant 0 : index
    %329 = vector.load %arg1[%328, %c0_115, %c0_116] : memref<8x4x128xf32, #tpu.memory_space<vmem>>, vector<1x4x128xf32>
    %330 = vector.shape_cast %329 : vector<1x4x128xf32> to vector<4x128xf32>
    %cst_117 = arith.constant dense<0.000000e+00> : vector<4x128xf32>
    %331 = tpu.matmul %1, %327, %cst_117 {dimension_numbers = #tpu.dot_dimension_numbers<[1], [0], [0], [1], [0, 0, 1, 1], [], []>} : vector<4x8xf32>, vector<8x128xf32>, vector<4x128xf32> -> vector<4x128xf32>
    %332 = arith.subf %331, %330 : vector<4x128xf32>
    %333 = arith.mulf %332, %332 : vector<4x128xf32>
    %cst_118 = arith.constant dense<0.000000e+00> : vector<128xf32>
    %334 = vector.multi_reduction <add>, %333, %cst_118 [0] : vector<4x128xf32> to vector<128xf32>
    %335 = vector.shape_cast %334 : vector<128xf32> to vector<1x128xf32>
    %cst_119 = arith.constant -3.125000e+00 : f32
    %336 = vector.broadcast %cst_119 : f32 to vector<1x128xf32>
    %337 = arith.mulf %336, %335 : vector<1x128xf32>
    %338 = arith.addf %294, %337 : vector<1x128xf32>
    %339 = vector.broadcast %338 : vector<1x128xf32> to vector<2x128xf32>
    %340 = arith.addf %339, %6 : vector<2x128xf32>
    %cst_120 = arith.constant dense<0xFF800000> : vector<2xf32>
    %341 = vector.multi_reduction <maximumf>, %340, %cst_120 [1] : vector<2x128xf32> to vector<2xf32>
    %342 = vector.shape_cast %341 : vector<2xf32> to vector<2x1xf32>
    %343 = vector.broadcast %342 : vector<2x1xf32> to vector<2x128xf32>
    %344 = arith.mulf %343, %2 : vector<2x128xf32>
    %cst_121 = arith.constant dense<0.000000e+00> : vector<128xf32>
    %345 = vector.multi_reduction <add>, %344, %cst_121 [0] : vector<2x128xf32> to vector<128xf32>
    %346 = vector.shape_cast %345 : vector<128xf32> to vector<1x128xf32>
    %347 = arith.subf %338, %346 : vector<1x128xf32>
    %348 = math.exp %347 : vector<1x128xf32>
    %349 = vector.broadcast %348 : vector<1x128xf32> to vector<2x128xf32>
    %350 = arith.mulf %349, %2 : vector<2x128xf32>
    %cst_122 = arith.constant dense<0.000000e+00> : vector<2xf32>
    %351 = vector.multi_reduction <add>, %350, %cst_122 [1] : vector<2x128xf32> to vector<2xf32>
    %352 = vector.shape_cast %351 : vector<2xf32> to vector<2x1xf32>
    %353 = tpu.reciprocal %352 {approx = true} : vector<2x1xf32> -> vector<2x1xf32>
    %354 = arith.mulf %352, %353 : vector<2x1xf32>
    %cst_123 = arith.constant 2.000000e+00 : f32
    %355 = vector.broadcast %cst_123 : f32 to vector<2x1xf32>
    %356 = arith.subf %355, %354 : vector<2x1xf32>
    %357 = arith.mulf %353, %356 : vector<2x1xf32>
    %358 = arith.mulf %352, %357 : vector<2x1xf32>
    %cst_124 = arith.constant 2.000000e+00 : f32
    %359 = vector.broadcast %cst_124 : f32 to vector<2x1xf32>
    %360 = arith.subf %359, %358 : vector<2x1xf32>
    %361 = arith.mulf %357, %360 : vector<2x1xf32>
    %362 = vector.shape_cast %327 : vector<8x128xf32> to vector<1x8x128xf32>
    %363 = vector.shape_cast %350 : vector<2x128xf32> to vector<2x1x128xf32>
    %364 = vector.broadcast %362 : vector<1x8x128xf32> to vector<2x8x128xf32>
    %365 = vector.broadcast %363 : vector<2x1x128xf32> to vector<2x8x128xf32>
    %366 = arith.mulf %364, %365 : vector<2x8x128xf32>
    %cst_125 = arith.constant dense<0.000000e+00> : vector<2x8xf32>
    %367 = vector.multi_reduction <add>, %366, %cst_125 [2] : vector<2x8x128xf32> to vector<2x8xf32>
    %368 = vector.broadcast %361 : vector<2x1xf32> to vector<2x8xf32>
    %369 = arith.mulf %367, %368 : vector<2x8xf32>
    %370 = arith.index_cast %c6_i32 : i32 to index
    %c0_126 = arith.constant 0 : index
    %c0_127 = arith.constant 0 : index
    %371 = vector.load %arg6[%370, %c0_126, %c0_127] : memref<8x2x8xf32, #tpu.memory_space<vmem>>, vector<1x2x8xf32>
    %372 = vector.shape_cast %371 : vector<1x2x8xf32> to vector<2x8xf32>
    %373 = vector.shape_cast %369 : vector<2x8xf32> to vector<1x2x8xf32>
    tpu.vector_store %arg6[%370, %c0_126, %c0_127], %373 {strides = array<i32>} : memref<8x2x8xf32, #tpu.memory_space<vmem>>, vector<1x2x8xf32>,
    %c7_i32 = arith.constant 7 : i32
    %cst_128 = arith.constant dense<0.000000e+00> : vector<8x128xf32>
    %374 = tpu.matmul %0, %327, %cst_128 {dimension_numbers = #tpu.dot_dimension_numbers<[1], [0], [0], [1], [0, 0, 1, 1], [], []>} : vector<8x8xf32>, vector<8x128xf32>, vector<8x128xf32> -> vector<8x128xf32>
    %375 = arith.index_cast %c7_i32 : i32 to index
    %c0_129 = arith.constant 0 : index
    %c0_130 = arith.constant 0 : index
    %376 = vector.load %arg2[%375, %c0_129, %c0_130] : memref<8x8x128xf32, #tpu.memory_space<vmem>>, vector<1x8x128xf32>
    %377 = vector.shape_cast %376 : vector<1x8x128xf32> to vector<8x128xf32>
    %cst_131 = arith.constant 5.000000e-01 : f32
    %378 = vector.broadcast %cst_131 : f32 to vector<8x128xf32>
    %379 = arith.mulf %378, %377 : vector<8x128xf32>
    %380 = arith.addf %374, %379 : vector<8x128xf32>
    %381 = arith.index_cast %c7_i32 : i32 to index
    %c0_132 = arith.constant 0 : index
    %c0_133 = arith.constant 0 : index
    %382 = vector.load %arg1[%381, %c0_132, %c0_133] : memref<8x4x128xf32, #tpu.memory_space<vmem>>, vector<1x4x128xf32>
    %383 = vector.shape_cast %382 : vector<1x4x128xf32> to vector<4x128xf32>
    %cst_134 = arith.constant dense<0.000000e+00> : vector<4x128xf32>
    %384 = tpu.matmul %1, %380, %cst_134 {dimension_numbers = #tpu.dot_dimension_numbers<[1], [0], [0], [1], [0, 0, 1, 1], [], []>} : vector<4x8xf32>, vector<8x128xf32>, vector<4x128xf32> -> vector<4x128xf32>
    %385 = arith.subf %384, %383 : vector<4x128xf32>
    %386 = arith.mulf %385, %385 : vector<4x128xf32>
    %cst_135 = arith.constant dense<0.000000e+00> : vector<128xf32>
    %387 = vector.multi_reduction <add>, %386, %cst_135 [0] : vector<4x128xf32> to vector<128xf32>
    %388 = vector.shape_cast %387 : vector<128xf32> to vector<1x128xf32>
    %cst_136 = arith.constant -3.125000e+00 : f32
    %389 = vector.broadcast %cst_136 : f32 to vector<1x128xf32>
    %390 = arith.mulf %389, %388 : vector<1x128xf32>
    %391 = arith.addf %347, %390 : vector<1x128xf32>
    %392 = vector.broadcast %391 : vector<1x128xf32> to vector<2x128xf32>
    %393 = arith.addf %392, %6 : vector<2x128xf32>
    %cst_137 = arith.constant dense<0xFF800000> : vector<2xf32>
    %394 = vector.multi_reduction <maximumf>, %393, %cst_137 [1] : vector<2x128xf32> to vector<2xf32>
    %395 = vector.shape_cast %394 : vector<2xf32> to vector<2x1xf32>
    %396 = vector.broadcast %395 : vector<2x1xf32> to vector<2x128xf32>
    %397 = arith.mulf %396, %2 : vector<2x128xf32>
    %cst_138 = arith.constant dense<0.000000e+00> : vector<128xf32>
    %398 = vector.multi_reduction <add>, %397, %cst_138 [0] : vector<2x128xf32> to vector<128xf32>
    %399 = vector.shape_cast %398 : vector<128xf32> to vector<1x128xf32>
    %400 = arith.subf %391, %399 : vector<1x128xf32>
    %401 = math.exp %400 : vector<1x128xf32>
    %402 = vector.broadcast %401 : vector<1x128xf32> to vector<2x128xf32>
    %403 = arith.mulf %402, %2 : vector<2x128xf32>
    %cst_139 = arith.constant dense<0.000000e+00> : vector<2xf32>
    %404 = vector.multi_reduction <add>, %403, %cst_139 [1] : vector<2x128xf32> to vector<2xf32>
    %405 = vector.shape_cast %404 : vector<2xf32> to vector<2x1xf32>
    %406 = tpu.reciprocal %405 {approx = true} : vector<2x1xf32> -> vector<2x1xf32>
    %407 = arith.mulf %405, %406 : vector<2x1xf32>
    %cst_140 = arith.constant 2.000000e+00 : f32
    %408 = vector.broadcast %cst_140 : f32 to vector<2x1xf32>
    %409 = arith.subf %408, %407 : vector<2x1xf32>
    %410 = arith.mulf %406, %409 : vector<2x1xf32>
    %411 = arith.mulf %405, %410 : vector<2x1xf32>
    %cst_141 = arith.constant 2.000000e+00 : f32
    %412 = vector.broadcast %cst_141 : f32 to vector<2x1xf32>
    %413 = arith.subf %412, %411 : vector<2x1xf32>
    %414 = arith.mulf %410, %413 : vector<2x1xf32>
    %415 = vector.shape_cast %380 : vector<8x128xf32> to vector<1x8x128xf32>
    %416 = vector.shape_cast %403 : vector<2x128xf32> to vector<2x1x128xf32>
    %417 = vector.broadcast %415 : vector<1x8x128xf32> to vector<2x8x128xf32>
    %418 = vector.broadcast %416 : vector<2x1x128xf32> to vector<2x8x128xf32>
    %419 = arith.mulf %417, %418 : vector<2x8x128xf32>
    %cst_142 = arith.constant dense<0.000000e+00> : vector<2x8xf32>
    %420 = vector.multi_reduction <add>, %419, %cst_142 [2] : vector<2x8x128xf32> to vector<2x8xf32>
    %421 = vector.broadcast %414 : vector<2x1xf32> to vector<2x8xf32>
    %422 = arith.mulf %420, %421 : vector<2x8xf32>
    %423 = arith.index_cast %c7_i32 : i32 to index
    %c0_143 = arith.constant 0 : index
    %c0_144 = arith.constant 0 : index
    %424 = vector.load %arg6[%423, %c0_143, %c0_144] : memref<8x2x8xf32, #tpu.memory_space<vmem>>, vector<1x2x8xf32>
    %425 = vector.shape_cast %424 : vector<1x2x8xf32> to vector<2x8xf32>
    %426 = vector.shape_cast %422 : vector<2x8xf32> to vector<1x2x8xf32>
    tpu.vector_store %arg6[%423, %c0_143, %c0_144], %426 {strides = array<i32>} : memref<8x2x8xf32, #tpu.memory_space<vmem>>, vector<1x2x8xf32>,
    %c7_i32_145 = arith.constant 7 : i32
    return
  }
  func.func @transform_0(%arg0: i32) -> (i32, i32, i32) {
    %c0_i32 = arith.constant 0 : i32
    %c0_i32_0 = arith.constant 0 : i32
    %c0_i32_1 = arith.constant 0 : i32
    %c0_i32_2 = arith.constant 0 : i32
    return %c0_i32, %c0_i32_0, %c0_i32_1 : i32, i32, i32
  }
  func.func @transform_1(%arg0: i32) -> (i32, i32, i32) {
    %c0_i32 = arith.constant 0 : i32
    %c0_i32_0 = arith.constant 0 : i32
    %c0_i32_1 = arith.constant 0 : i32
    %c0_i32_2 = arith.constant 0 : i32
    return %c0_i32, %c0_i32_0, %c0_i32_1 : i32, i32, i32
  }
  func.func @transform_2(%arg0: i32) -> (i32, i32) {
    %c0_i32 = arith.constant 0 : i32
    %c0_i32_0 = arith.constant 0 : i32
    %c0_i32_1 = arith.constant 0 : i32
    return %c0_i32, %c0_i32_0 : i32, i32
  }
  func.func @transform_3(%arg0: i32) -> (i32, i32) {
    %c0_i32 = arith.constant 0 : i32
    %c0_i32_0 = arith.constant 0 : i32
    %c0_i32_1 = arith.constant 0 : i32
    return %c0_i32, %c0_i32_0 : i32, i32
  }
  func.func @transform_4(%arg0: i32) -> (i32, i32) {
    %c0_i32 = arith.constant 0 : i32
    %c0_i32_0 = arith.constant 0 : i32
    %c0_i32_1 = arith.constant 0 : i32
    return %c0_i32, %c0_i32_0 : i32, i32
  }
  func.func @transform_5(%arg0: i32) -> (i32, i32, i32) {
    %c0_i32 = arith.constant 0 : i32
    %c0_i32_0 = arith.constant 0 : i32
    %c0_i32_1 = arith.constant 0 : i32
    %c0_i32_2 = arith.constant 0 : i32
    return %c0_i32, %c0_i32_0, %c0_i32_1 : i32, i32, i32
  }
}

</mosaic_0001>

<bundles_post_ra>
// kernel: tpu_custom_call.1
= control target key start
LH: loop header
LB: loop body
LE: loop exit
PB: predicated region body
PF: predicated region fallthrough
CT: control target
= control target key end

     0   :  { %10 = vsyncpa [#allocation3], 0  ;;  %s2763_s0 = inlined_call_operand.hbm [shape: f32[8,4,128], index: 0, kind: input, shape index: {}]   ;;  %s2764_s1 = inlined_call_operand.hbm [shape: f32[8,8,128], index: 1, kind: input, shape index: {}]   ;;  %s2765_s2 = inlined_call_operand.hbm [shape: f32[8,8], index: 2, kind: input, shape index: {}]   ;;  %s2766_s3 = inlined_call_operand.vmem [shape: f32[4,8], index: 3, kind: input, shape index: {}]   ;;  %s2767_s4 = inlined_call_operand.vmem [shape: f32[2,128], index: 4, kind: input, shape index: {}]   ;;  %s2768_s5 = inlined_call_operand.hbm [shape: f32[8,2,8], index: 5, kind: output, shape index: {}]  }
   0x1   :  { %11 = vsyncpa [#allocation6], 0 }
   0x2   :  { %12 = vsyncpa [#allocation4], 0  ;;  %s2317_s18 = smov [#allocation5]   ;;  %s2223_s22 = scalar_lea.hbm %s2764_s1, 1024 }
   0x3   :  { %s30_s19 = sshll.u32 %s2317_s18, 4  ;;  %p2224_p0 = scmp.ne.s32.totalorder %s2764_s1, %s2223_s22  ;;  %s31_s19 = int_to_ptr.vmem [resolvable:$true] %s30_s19 }
   0x4   :  { %p2227_p1 = scmp.lt.u32.totalorder %s2223_s22, %s2764_s1 }
   0x6   :  { %p2229_p2 = pnand %p2227_p1, %p2224_p0 }
   0x8   :  { %2232 = shalt.err (!%p2229_p2)
}
   0x9   :  { %s2233_s27 = scalar_lea.vmem %s31_s19, 1024  ;;  %p2238_p4 = scmp.lt.s32.totalorder %s31_s19, %s31_s19 }
   0xa   :  { %p2234_p3 = scmp.ne.s32.totalorder %s31_s19, %s2233_s27  ;;  %p2239_p5 = scmp.lt.s32.totalorder %s2233_s27, %s2233_s27 }
   0xc   :  { %p2240_p6 = por %p2239_p5, %p2238_p4 }
   0xe   :  { %p2241_p7 = pnand %p2240_p6, %p2234_p3 }
  0x10   :  { %2244 = shalt.err (!%p2241_p7)
}
  0x11   :  { %s2318_s28 = smov 128   ;;  %s2319_s29 = smov 8  }
  0x12   :  { %36 = dma.hbm_to_vmem [thread:$0]  %s2764_s1, 1024, %s31_s19, [#allocation6], %s2318_s28, %s2318_s28, %s2319_s29  }
  0x13   :  { %s2320_s7 = smov [#allocation2]   ;;  %s2245_s11 = scalar_lea.hbm %s2763_s0, 512 }
  0x14   :  { %s18_s8 = sshll.u32 %s2320_s7, 4  ;;  %p2246_p8 = scmp.ne.s32.totalorder %s2763_s0, %s2245_s11  ;;  %s19_s8 = int_to_ptr.vmem [resolvable:$true] %s18_s8 }
  0x15   :  { %p2249_p9 = scmp.lt.u32.totalorder %s2245_s11, %s2763_s0 }
  0x17   :  { %p2251_p10 = pnand %p2249_p9, %p2246_p8 }
  0x19   :  { %2254 = shalt.err (!%p2251_p10)
}
  0x1a   :  { %s2255_s16 = scalar_lea.vmem %s19_s8, 512  ;;  %p2260_p12 = scmp.lt.s32.totalorder %s19_s8, %s19_s8 }
  0x1b   :  { %p2256_p11 = scmp.ne.s32.totalorder %s19_s8, %s2255_s16  ;;  %p2261_p13 = scmp.lt.s32.totalorder %s2255_s16, %s2255_s16 }
  0x1d   :  { %p2262_p0 = por %p2261_p13, %p2260_p12 }
  0x1f   :  { %p2263_p1 = pnand %p2262_p0, %p2256_p11 }
  0x21   :  { %2266 = shalt.err (!%p2263_p1)
}
  0x22   :  { %s2321_s1 = smov 64   ;;  %s2322_s17 = smov 4  }
  0x23   :  { %24 = dma.hbm_to_vmem [thread:$0]  %s2763_s0, 512, %s19_s8, [#allocation3], %s2321_s1, %s2321_s1, %s2322_s17  }
  0x24   :  { %s2323_s20 = smov [#allocation7]   ;;  %s2267_s24 = scalar_lea.hbm %s2765_s2, 128 }
  0x25   :  { %s43_s21 = sshll.u32 %s2323_s20, 4  ;;  %p2268_p2 = scmp.ne.s32.totalorder %s2765_s2, %s2267_s24  ;;  %s44_s21 = int_to_ptr.vmem [resolvable:$true] %s43_s21 }
  0x26   :  { %p2271_p3 = scmp.lt.u32.totalorder %s2267_s24, %s2765_s2 }
  0x28   :  { %p2273_p4 = pnand %p2271_p3, %p2268_p2 }
  0x2a   :  { %2276 = shalt.err (!%p2273_p4)
}
  0x2b   :  { %s2277_s29 = scalar_lea.vmem %s44_s21, 128  ;;  %p2282_p6 = scmp.lt.s32.totalorder %s44_s21, %s44_s21 }
  0x2c   :  { %p2278_p5 = scmp.ne.s32.totalorder %s44_s21, %s2277_s29  ;;  %p2283_p7 = scmp.lt.s32.totalorder %s2277_s29, %s2277_s29 }
  0x2e   :  { %p2284_p8 = por %p2283_p7, %p2282_p6 }
  0x30   :  { %p2285_p9 = pnand %p2284_p8, %p2278_p5 }
  0x32   :  { %2288 = shalt.err (!%p2285_p9)
}
  0x33   :  { %46 = dma.hbm_to_vmem [thread:$0]  %s2765_s2, 128, %s44_s21, [#allocation6]  }
  0x34   :  { %2311 = dma.done.wait [#allocation3], 512  }
  0x35   :  { %2312 = vsyncadd [#allocation3], 4294966784 }
  0x36   :  { %2313 = dma.done.wait [#allocation6], 1152  }
  0x37   :  { %2314 = vsyncadd [#allocation6], 4294966144  ;;  %v2324_v0 = vmov 0.0   ;;  %vm2325_vm0 = vmmov 0   ;;  %vm67_vm1 = vcmask 64512   ;;  %v2403_v1 = vld [vmem:[#allocation5] sm:$0xff] }
  0x38   :  { %2105 = vmatprep.subr.mxu1 %v2324_v0  ;;  %2107 = vmatprep.mubr.msk.f32.mxu1 %vm2325_vm0, %v2324_v0  ;;  %v2405_v2 = vld [vmem:[#allocation7] sm:$0xff]  ;;  %v256_v4 = vld [vmem:[#allocation5 + $0x8] sm:$0xff]  ;;  %vm143_vm2 = vcmask 1043456   ;;  %vm154_vm3 = vcmask 1041408   ;;  %v513_v31 = vld [vmem:[#allocation5 + $0x10] sm:$0xff]  ;;  %vm250_vm4 = vcmask 1041409  }
  0x39   :  { %2100 = vmatprep.subr.mxu0 %v2324_v0  ;;  %2102 = vmatprep.mubr.msk.f32.mxu0 %vm2325_vm0, %v2324_v0  ;;  %v2410_v3 = vld [vmem:[%s2766_s3] sm:$0xf]  ;;  %v257_v5 = vmul.f32 0.5, %v256_v4  ;;  %v514_v33 = vmul.f32 0.5, %v513_v31  ;;  %v332_v34 = vld [vmem:[#allocation2 + $0x4] sm:$0xf] }
  0x3a   :  { %2106 = vmatpush3.msra.mxu1 %v2403_v1  ;;  %2101 = vmatpush3.msra.mxu0 %v2403_v1  ;;  %v66_v6 = vld [vmem:[#allocation2] sm:$0xf]  ;;  %v767_v62 = vld [vmem:[#allocation5 + $0x18] sm:$0xff]  ;;  %vm253_vm5 = vcmask 58368  }
  0x3b   :  { %2108 = vmatmul.mubr.msk.f32.vlgmr.msra.gmra.mrb[0].mxu1 %vm67_vm1, %v2405_v2  ;;  %2103 = vmatmul.mubr.msk.f32.vlgmr.msra.gmra.mrb[0].mxu0 %vm67_vm1, %v2410_v3  ;;  %v2442_v17 = vld [vmem:[%s2767_s4] sm:$0x3]  ;;  %v768_v63 = vmul.f32 0.5, %v767_v62  ;;  %s2328_s4 = smov [#allocation8]  }
  0x3c   :  { %2110 = vmatprep.subr.mxu0 %v2324_v0  ;;  %2115 = vmatprep.subr.mxu1 %v2324_v0  ;;  %v2054_v20 = vadd.f32 -1.0, %v2442_v17  ;;  %s2041_s8 = sshll.u32 %s2328_s4, 4  ;;  %s2042_s8 = int_to_ptr.vmem [resolvable:$true] %s2041_s8 }
  0x3d   :  { %2112 = vmatprep.mubr.msk.f32.mxu0 %vm2325_vm0, %v2324_v0  ;;  %2117 = vmatprep.mubr.msk.f32.mxu1 %vm2325_vm0, %v2324_v0  ;;  %s2289_s9 = scalar_lea.vmem %s2042_s8, 256  ;;  %p2294_p11 = scmp.lt.s32.totalorder %s2042_s8, %s2042_s8 }
  0x3e   :  { %v2445_v22 = vmul.f32 1e+30, %v2054_v20  ;;  %p2290_p10 = scmp.ne.s32.totalorder %s2042_s8, %s2289_s9  ;;  %p2295_p12 = scmp.lt.s32.totalorder %s2289_s9, %s2289_s9 }
  0x40   :  { %p2296_p13 = por %p2295_p12, %p2294_p11 }
  0x42   :  { %p2297_p0 = pnand %p2296_p13, %p2290_p10 }
 0x10e   :  { %v327_v7 = vpop.f32.mrb[0].mxu1  ;;  %v137_v8 = vpop.f32.mrb[0].mxu0 }
 0x10f   :  { %v2424_v9 = vadd.f32 %v327_v7, %v257_v5  ;;  %v2109_v10 = vpop.f32.mrb[1].mxu1  ;;  %v141_v11 = vsub.f32 %v137_v8, %v66_v6  ;;  %v2104_v12 = vpop.f32.mrb[1].mxu0  ;;  %v586_v5 = vld [vmem:[#allocation2 + $0x8] sm:$0xf] }
 0x111   :  { %2111 = vmatpush3.msra.mxu0 %v2424_v9  ;;  %2116 = vmatpush3.msra.mxu1 %v2424_v9  ;;  %v142_v13 = vmul.f32 %v141_v11, %v141_v11 }
 0x112   :  { %2113 = vmatmul.mubr.msk.f32.vlgmr.msra.gmra.mrb[2].mxu0 %vm67_vm1, %v2410_v3  ;;  %2118 = vmatmul.mubr.msk.f32.vlgmr.msra.gmra.mrb[2].mxu1 %vm67_vm1, %v2405_v2 }
 0x113   :  { %v144_v14 = vsel %vm143_vm2, %v142_v13, 0.0  ;;  %2120 = vmatprep.subr.mxu0 %v2324_v0  ;;  %2125 = vmatprep.subr.mxu1 %v2324_v0 }
 0x114   :  { %v145_v15 = vrot.slane %v144_v14, 4  ;;  %2122 = vmatprep.mubr.msk.f32.mxu0 %vm2325_vm0, %v2324_v0  ;;  %2127 = vmatprep.mubr.msk.f32.mxu1 %vm2325_vm0, %v2324_v0 }
 0x116   :  { %v146_v16 = vadd.f32 %v145_v15, %v144_v14 }
 0x118   :  { %v147_v18 = vrot.slane %v146_v16, 2 }
 0x11a   :  { %v148_v19 = vadd.f32 %v147_v18, %v146_v16 }
 0x11c   :  { %v149_v21 = vrot.slane %v148_v19, 1 }
 0x11e   :  { %v150_v23 = vadd.f32 %v149_v21, %v148_v19 }
 0x120   :  { %v151_v24 = vmul.f32 -3.125, %v150_v23 }
 0x122   :  { %v153_v25 = vadd.f32 %v151_v24, %v2445_v22 }
 0x124   :  { %v155_v26 = vsel %vm154_vm3, %v153_v25, -inf }
 0x125   :  { %156 = vmax.xlane.f32.xlu0 %v155_v26 }
 0x1b2   :  { %v157_v27 = vpop.xlane.xlu0 %156 }
 0x1b3   :  { %v158_v28 = vmul.f32 %v157_v27, %v2442_v17 }
 0x1b5   :  { %v159_v29 = vsel %vm154_vm3, %v158_v28, 0.0 }
 0x1b6   :  { %v160_v30 = vrot.slane %v159_v29, 4 }
 0x1b8   :  { %v161_v32 = vadd.f32 %v160_v30, %v159_v29 }
 0x1ba   :  { %v162_v37 = vrot.slane %v161_v32, 2 }
 0x1bc   :  { %v163_v43 = vadd.f32 %v162_v37, %v161_v32 }
 0x1be   :  { %v164_v47 = vrot.slane %v163_v43, 1 }
 0x1c0   :  { %v165_v50 = vadd.f32 %v164_v47, %v163_v43 }
 0x1c2   :  { %v2466_v52 = vsub.f32 %v151_v24, %v165_v50 }
 0x1e5   :  { %v399_v35 = vpop.f32.mrb[2].mxu0  ;;  %v581_v36 = vpop.f32.mrb[2].mxu1 }
 0x1e6   :  { %v403_v38 = vsub.f32 %v399_v35, %v332_v34  ;;  %v2451_v39 = vadd.f32 %v581_v36, %v514_v33  ;;  %v2119_v40 = vpop.f32.mrb[3].mxu1  ;;  %v2114_v41 = vpop.f32.mrb[3].mxu0  ;;  %v1021_v36 = vld [vmem:[#allocation5 + $0x20] sm:$0xff] }
 0x1e7   :  { %v1022_v37 = vmul.f32 0.5, %v1021_v36  ;;  %v840_v40 = vld [vmem:[#allocation2 + $0xc] sm:$0xf] }
 0x1e8   :  { %v404_v42 = vmul.f32 %v403_v38, %v403_v38  ;;  %2121 = vmatpush3.msra.mxu0 %v2451_v39  ;;  %2126 = vmatpush3.msra.mxu1 %v2451_v39 }
 0x1e9   :  { %2123 = vmatmul.mubr.msk.f32.vlgmr.msra.gmra.mrb[4].mxu0 %vm67_vm1, %v2410_v3  ;;  %2128 = vmatmul.mubr.msk.f32.vlgmr.msra.gmra.mrb[4].mxu1 %vm67_vm1, %v2405_v2 }
 0x1ea   :  { %v405_v44 = vsel %vm143_vm2, %v404_v42, 0.0  ;;  %2130 = vmatprep.subr.mxu0 %v2324_v0  ;;  %2135 = vmatprep.subr.mxu1 %v2324_v0 }
 0x1eb   :  { %v406_v45 = vrot.slane %v405_v44, 4  ;;  %2132 = vmatprep.mubr.msk.f32.mxu0 %vm2325_vm0, %v2324_v0  ;;  %2137 = vmatprep.mubr.msk.f32.mxu1 %vm2325_vm0, %v2324_v0 }
 0x1ed   :  { %v407_v46 = vadd.f32 %v406_v45, %v405_v44 }
 0x1ef   :  { %v408_v48 = vrot.slane %v407_v46, 2 }
 0x1f1   :  { %v409_v49 = vadd.f32 %v408_v48, %v407_v46 }
 0x1f3   :  { %v410_v51 = vrot.slane %v409_v49, 1 }
 0x1f5   :  { %v411_v53 = vadd.f32 %v410_v51, %v409_v49 }
 0x1f7   :  { %v412_v54 = vmul.f32 -3.125, %v411_v53 }
 0x1f9   :  { %v413_v55 = vadd.f32 %v412_v54, %v2466_v52 }
 0x1fb   :  { %v414_v56 = vadd.f32 %v413_v55, %v2445_v22 }
 0x1fd   :  { %v415_v57 = vsel %vm154_vm3, %v414_v56, -inf }
 0x1fe   :  { %416 = vmax.xlane.f32.xlu0 %v415_v57 }
 0x28b   :  { %v417_v58 = vpop.xlane.xlu0 %416 }
 0x28c   :  { %v418_v59 = vmul.f32 %v417_v58, %v2442_v17 }
 0x28e   :  { %v419_v60 = vsel %vm154_vm3, %v418_v59, 0.0 }
 0x28f   :  { %v420_v61 = vrot.slane %v419_v60, 4 }
 0x291   :  { %v421_v4 = vadd.f32 %v420_v61, %v419_v60 }
 0x293   :  { %v422_v13 = vrot.slane %v421_v4, 2 }
 0x295   :  { %v423_v16 = vadd.f32 %v422_v13, %v421_v4 }
 0x297   :  { %v424_v20 = vrot.slane %v423_v16, 1 }
 0x299   :  { %v425_v24 = vadd.f32 %v424_v20, %v423_v16 }
 0x29b   :  { %v2488_v27 = vsub.f32 %v413_v55, %v425_v24 }
 0x2bc   :  { %v653_v6 = vpop.f32.mrb[4].mxu0  ;;  %v835_v7 = vpop.f32.mrb[4].mxu1 }
 0x2bd   :  { %v657_v8 = vsub.f32 %v653_v6, %v586_v5  ;;  %v2473_v10 = vadd.f32 %v835_v7, %v768_v63  ;;  %v2129_v11 = vpop.f32.mrb[5].mxu1  ;;  %v2124_v12 = vpop.f32.mrb[5].mxu0 }
 0x2be   :  { %v1275_v11 = vld [vmem:[#allocation5 + $0x28] sm:$0xff] }
 0x2bf   :  { %v658_v14 = vmul.f32 %v657_v8, %v657_v8  ;;  %2131 = vmatpush3.msra.mxu0 %v2473_v10  ;;  %2136 = vmatpush3.msra.mxu1 %v2473_v10  ;;  %v1276_v12 = vmul.f32 0.5, %v1275_v11 }
 0x2c0   :  { %2133 = vmatmul.mubr.msk.f32.vlgmr.msra.gmra.mrb[6].mxu0 %vm67_vm1, %v2410_v3  ;;  %2138 = vmatmul.mubr.msk.f32.vlgmr.msra.gmra.mrb[6].mxu1 %vm67_vm1, %v2405_v2 }
 0x2c1   :  { %v659_v15 = vsel %vm143_vm2, %v658_v14, 0.0  ;;  %2140 = vmatprep.subr.mxu0 %v2324_v0  ;;  %2145 = vmatprep.subr.mxu1 %v2324_v0  ;;  %v1094_v14 = vld [vmem:[#allocation2 + $0x10] sm:$0xf] }
 0x2c2   :  { %v660_v18 = vrot.slane %v659_v15, 4  ;;  %2142 = vmatprep.mubr.msk.f32.mxu0 %vm2325_vm0, %v2324_v0  ;;  %2147 = vmatprep.mubr.msk.f32.mxu1 %vm2325_vm0, %v2324_v0 }
 0x2c4   :  { %v661_v19 = vadd.f32 %v660_v18, %v659_v15 }
 0x2c6   :  { %v662_v21 = vrot.slane %v661_v19, 2 }
 0x2c8   :  { %v663_v23 = vadd.f32 %v662_v21, %v661_v19 }
 0x2ca   :  { %v664_v25 = vrot.slane %v663_v23, 1 }
 0x2cc   :  { %v665_v26 = vadd.f32 %v664_v25, %v663_v23 }
 0x2ce   :  { %v666_v28 = vmul.f32 -3.125, %v665_v26 }
 0x2d0   :  { %v667_v29 = vadd.f32 %v666_v28, %v2488_v27 }
 0x2d2   :  { %v668_v30 = vadd.f32 %v667_v29, %v2445_v22 }
 0x2d4   :  { %v669_v31 = vsel %vm154_vm3, %v668_v30, -inf }
 0x2d5   :  { %670 = vmax.xlane.f32.xlu1 %v669_v31 }
 0x362   :  { %v671_v32 = vpop.xlane.xlu1 %670 }
 0x363   :  { %v672_v33 = vmul.f32 %v671_v32, %v2442_v17 }
 0x365   :  { %v673_v34 = vsel %vm154_vm3, %v672_v33, 0.0 }
 0x366   :  { %v674_v35 = vrot.slane %v673_v34, 4 }
 0x368   :  { %v675_v38 = vadd.f32 %v674_v35, %v673_v34 }
 0x36a   :  { %v676_v47 = vrot.slane %v675_v38, 2 }
 0x36c   :  { %v677_v50 = vadd.f32 %v676_v47, %v675_v38 }
 0x36e   :  { %v678_v54 = vrot.slane %v677_v50, 1 }
 0x370   :  { %v679_v57 = vadd.f32 %v678_v54, %v677_v50 }
 0x372   :  { %v2510_v60 = vsub.f32 %v667_v29, %v679_v57 }
 0x393   :  { %v907_v41 = vpop.f32.mrb[6].mxu0  ;;  %v1089_v42 = vpop.f32.mrb[6].mxu1 }
 0x394   :  { %v911_v43 = vsub.f32 %v907_v41, %v840_v40  ;;  %v2495_v44 = vadd.f32 %v1089_v42, %v1022_v37  ;;  %v2139_v45 = vpop.f32.mrb[7].mxu1  ;;  %v2134_v46 = vpop.f32.mrb[7].mxu0 }
 0x395   :  { %v167_v46 = vmul.f32 1.442695, %v2466_v52  ;;  %v2326_v52 = vmov 1966171168  }
 0x396   :  { %v912_v48 = vmul.f32 %v911_v43, %v911_v43  ;;  %2141 = vmatpush3.msra.mxu0 %v2495_v44  ;;  %2146 = vmatpush3.msra.mxu1 %v2495_v44 }
 0x397   :  { %2143 = vmatmul.mubr.msk.f32.vlgmr.msra.gmra.mrb[8].mxu0 %vm67_vm1, %v2410_v3  ;;  %2148 = vmatmul.mubr.msk.f32.vlgmr.msra.gmra.mrb[8].mxu1 %vm67_vm1, %v2405_v2  ;;  %2191 = vpow2.f32 %v167_v46 }
 0x398   :  { %v913_v49 = vsel %vm143_vm2, %v912_v48, 0.0  ;;  %2150 = vmatprep.subr.mxu0 %v2324_v0  ;;  %2155 = vmatprep.subr.mxu1 %v2324_v0  ;;  %v1529_v48 = vld [vmem:[#allocation5 + $0x30] sm:$0xff] }
 0x399   :  { %v914_v51 = vrot.slane %v913_v49, 4  ;;  %2152 = vmatprep.mubr.msk.f32.mxu0 %vm2325_vm0, %v2324_v0  ;;  %2157 = vmatprep.mubr.msk.f32.mxu1 %vm2325_vm0, %v2324_v0 }
 0x39b   :  { %v915_v53 = vadd.f32 %v914_v51, %v913_v49  ;;  %v1530_v49 = vmul.f32 0.5, %v1529_v48  ;;  %v1348_v51 = vld [vmem:[#allocation2 + $0x14] sm:$0xf] }
 0x39d   :  { %v916_v55 = vrot.slane %v915_v53, 2 }
 0x39f   :  { %v917_v56 = vadd.f32 %v916_v55, %v915_v53 }
 0x3a1   :  { %v918_v58 = vrot.slane %v917_v56, 1  ;;  %v2192_v11 = vpop.eup %2191 }
 0x3a3   :  { %v919_v59 = vadd.f32 %v918_v58, %v917_v56 }
 0x3a5   :  { %v920_v61 = vmul.f32 -3.125, %v919_v59  ;;  %v427_v59 = vmul.f32 1.442695, %v2488_v27 }
 0x3a7   :  { %v921_v62 = vadd.f32 %v920_v61, %v2510_v60  ;;  %2193 = vpow2.f32 %v427_v59 }
 0x3a9   :  { %v922_v63 = vadd.f32 %v921_v62, %v2445_v22 }
 0x3ab   :  { %v923_v4 = vsel %vm154_vm3, %v922_v63, -inf  ;;  %v182_v63 = vunpack.c.l.s4 %v2326_v52 }
 0x3ac   :  { %924 = vmax.xlane.f32.xlu1 %v923_v4  ;;  %v184_v4 = vlaneseq }
 0x439   :  { %v925_v5 = vpop.xlane.xlu1 %924 }
 0x43a   :  { %v926_v6 = vmul.f32 %v925_v5, %v2442_v17 }
 0x43c   :  { %v927_v7 = vsel %vm154_vm3, %v926_v6, 0.0 }
 0x43d   :  { %v928_v8 = vrot.slane %v927_v7, 4 }
 0x43f   :  { %v929_v13 = vadd.f32 %v928_v8, %v927_v7  ;;  %v183_v7 = vunpack.c.0.s8 %v182_v63  ;;  %v2554_v8 = vshrl.u32 %v184_v4, 7 }
 0x441   :  { %v930_v23 = vrot.slane %v929_v13, 2 }
 0x443   :  { %v931_v26 = vadd.f32 %v930_v23, %v929_v13 }
 0x445   :  { %v932_v30 = vrot.slane %v931_v26, 1 }
 0x447   :  { %v933_v33 = vadd.f32 %v932_v30, %v931_v26 }
 0x449   :  { %v2532_v36 = vsub.f32 %v921_v62, %v933_v33 }
 0x46a   :  { %v1161_v15 = vpop.f32.mrb[8].mxu0  ;;  %v1343_v16 = vpop.f32.mrb[8].mxu1 }
 0x46b   :  { %v1165_v18 = vsub.f32 %v1161_v15, %v1094_v14  ;;  %v2517_v19 = vadd.f32 %v1343_v16, %v1276_v12  ;;  %v2149_v20 = vpop.f32.mrb[9].mxu1  ;;  %v2144_v21 = vpop.f32.mrb[9].mxu0  ;;  %v2558_v15 = vsub.s32 %v183_v7, %v2554_v8  ;;  %v1602_v7 = vld [vmem:[#allocation2 + $0x18] sm:$0xf] }
 0x46c   :  { %v2194_v21 = vpop.eup %2193 }
 0x46d   :  { %v1166_v24 = vmul.f32 %v1165_v18, %v1165_v18  ;;  %2151 = vmatpush3.msra.mxu0 %v2517_v19  ;;  %2156 = vmatpush3.msra.mxu1 %v2517_v19 }
 0x46e   :  { %2153 = vmatmul.mubr.msk.f32.vlgmr.msra.gmra.mrb[10].mxu0 %vm67_vm1, %v2410_v3  ;;  %2158 = vmatmul.mubr.msk.f32.vlgmr.msra.gmra.mrb[10].mxu1 %vm67_vm1, %v2405_v2 }
 0x46f   :  { %v1167_v25 = vsel %vm143_vm2, %v1166_v24, 0.0  ;;  %2160 = vmatprep.subr.mxu0 %v2324_v0  ;;  %2165 = vmatprep.subr.mxu1 %v2324_v0 }
 0x470   :  { %v1168_v28 = vrot.slane %v1167_v25, 4  ;;  %2162 = vmatprep.mubr.msk.f32.mxu0 %vm2325_vm0, %v2324_v0  ;;  %2167 = vmatprep.mubr.msk.f32.mxu1 %vm2325_vm0, %v2324_v0 }
 0x472   :  { %v1169_v29 = vadd.f32 %v1168_v28, %v1167_v25  ;;  %v429_v28 = vmul.f32 %v2194_v21, %v2442_v17 }
 0x474   :  { %v1170_v31 = vrot.slane %v1169_v29, 2 }
 0x476   :  { %v1171_v32 = vadd.f32 %v1170_v31, %v1169_v29 }
 0x478   :  { %v1172_v34 = vrot.slane %v1171_v32, 1 }
 0x47a   :  { %v1173_v35 = vadd.f32 %v1172_v34, %v1171_v32  ;;  %v2572_v32 = vrot.slane %v429_v28, %v2558_v15  ;;  %v2576_v34 = vsub.s32 0, %v2554_v8 }
 0x47c   :  { %v1174_v37 = vmul.f32 -3.125, %v1173_v35 }
 0x47e   :  { %v1175_v38 = vadd.f32 %v1174_v37, %v2532_v36  ;;  %v448_v37 = vcombine.high %v2572_v32, %v2572_v32 }
 0x480   :  { %v1176_v40 = vadd.f32 %v1175_v38, %v2445_v22 }
 0x482   :  { %v1177_v41 = vsel %vm154_vm3, %v1176_v40, -inf }
 0x483   :  { %1178 = vmax.xlane.f32.xlu0 %v1177_v41  ;;  %v462_v41 = vrot.slane %v448_v37, %v2558_v15 }
 0x510   :  { %v1179_v42 = vpop.xlane.xlu0 %1178 }
 0x511   :  { %v1180_v43 = vmul.f32 %v1179_v42, %v2442_v17  ;;  %v470_v42 = vrot.slane %v462_v41, %v2576_v34 }
 0x513   :  { %v1181_v45 = vsel %vm154_vm3, %v1180_v43, 0.0  ;;  %v430_v43 = vsel %vm154_vm3, %v429_v28, 0.0 }
 0x514   :  { %v1182_v47 = vrot.slane %v1181_v45, 4 }
 0x516   :  { %v1183_v50 = vadd.f32 %v1182_v47, %v1181_v45  ;;  %v474_v45 = vmul.f32 %v470_v42, %v2424_v9 }
 0x518   :  { %v1184_v61 = vrot.slane %v1183_v50, 2 }
 0x51a   :  { %v1185_v27 = vadd.f32 %v1184_v61, %v1183_v50 }
 0x51c   :  { %v1186_v13 = vrot.slane %v1185_v27, 1 }
 0x51e   :  { %v1187_v18 = vadd.f32 %v1186_v13, %v1185_v27 }
 0x520   :  { %v2563_v24 = vsub.f32 %v1175_v38, %v1187_v18 }
 0x541   :  { %v1415_v53 = vpop.f32.mrb[10].mxu0  ;;  %v1597_v54 = vpop.f32.mrb[10].mxu1 }
 0x542   :  { %v1419_v55 = vsub.f32 %v1415_v53, %v1348_v51  ;;  %v2540_v56 = vadd.f32 %v1597_v54, %v1530_v49  ;;  %v2159_v57 = vpop.f32.mrb[11].mxu1  ;;  %v2154_v58 = vpop.f32.mrb[11].mxu0 }
 0x544   :  { %v1420_v62 = vmul.f32 %v1419_v55, %v1419_v55  ;;  %2161 = vmatpush3.msra.mxu0 %v2540_v56  ;;  %2166 = vmatpush3.msra.mxu1 %v2540_v56  ;;  %v2588_v55 = vsub.s32 1, %v2554_v8 }
 0x545   :  { %2163 = vmatmul.mubr.msk.f32.vlgmr.msra.gmra.mrb[12].mxu0 %vm67_vm1, %v2410_v3  ;;  %2168 = vmatmul.mubr.msk.f32.vlgmr.msra.gmra.mrb[12].mxu1 %vm67_vm1, %v2405_v2  ;;  %v169_v2 = vmul.f32 %v2192_v11, %v2442_v17 }
 0x546   :  { %v1421_v5 = vsel %vm143_vm2, %v1420_v62, 0.0  ;;  %2170 = vmatprep.subr.mxu0 %v2324_v0  ;;  %2172 = vmatprep.mubr.msk.f32.mxu0 %vm2325_vm0, %v2324_v0 }
 0x547   :  { %v1422_v6 = vrot.slane %v1421_v5, 4  ;;  %v2561_v0 = vrot.slane %v169_v2, %v2558_v15  ;;  %v170_v38 = vsel %vm154_vm3, %v169_v2, 0.0 }
 0x549   :  { %v1423_v12 = vadd.f32 %v1422_v6, %v1421_v5  ;;  %v188_v26 = vcombine.high %v2561_v0, %v2561_v0  ;;  %v1783_v5 = vld [vmem:[#allocation5 + $0x38] sm:$0xff]  ;;  %v195_v42 = vrot.slane %v2561_v0, %v2558_v15 }
 0x54a   :  { %v1784_v27 = vmul.f32 0.5, %v1783_v5 }
 0x54b   :  { %v1424_v14 = vrot.slane %v1423_v12, 2  ;;  %v202_v31 = vrot.slane %v188_v26, %v2558_v15 }
 0x54d   :  { %v1425_v16 = vadd.f32 %v1424_v14, %v1423_v12  ;;  %v210_v35 = vrot.slane %v202_v31, %v2576_v34 }
 0x54f   :  { %v1426_v20 = vrot.slane %v1425_v16, 1  ;;  %v214_v40 = vmul.f32 %v210_v35, %v2403_v1 }
 0x551   :  { %v1427_v23 = vadd.f32 %v1426_v20, %v1425_v16 }
 0x553   :  { %v1428_v25 = vmul.f32 -3.125, %v1427_v23  ;;  %v681_v23 = vmul.f32 1.442695, %v2510_v60  ;;  %v455_v60 = vrot.slane %v2572_v32, %v2558_v15 }
 0x555   :  { %v1429_v29 = vadd.f32 %v1428_v25, %v2563_v24 }
 0x557   :  { %v1430_v30 = vadd.f32 %v1429_v29, %v2445_v22 }
 0x559   :  { %v1431_v33 = vsel %vm154_vm3, %v1430_v30, -inf }
 0x55a   :  { %1432 = vmax.xlane.f32.xlu1 %v1431_v33 }
 0x55e   :  { %171 = vadd.xlane.f32.xlu1 %v170_v38 }
 0x562   :  { %217 = vadd.xlane.f32.xlu1 %v214_v40 }
 0x566   :  { %431 = vadd.xlane.f32.xlu1 %v430_v43 }
 0x56a   :  { %477 = vadd.xlane.f32.xlu1 %v474_v45 }
 0x5e7   :  { %v1433_v46 = vpop.xlane.xlu1 %1432 }
 0x5e8   :  { %v1434_v62 = vmul.f32 %v1433_v46, %v2442_v17  ;;  %v206_v46 = vrot.slane %v195_v42, %v2576_v34 }
 0x5ea   :  { %v1435_v52 = vsel %vm154_vm3, %v1434_v62, 0.0  ;;  %v213_v0 = vmul.f32 %v206_v46, %v2403_v1 }
 0x5eb   :  { %v172_v47 = vpop.xlane.xlu1 %171  ;;  %v1436_v63 = vrot.slane %v1435_v52, 4 }
 0x5ec   :  { %2195 = vrcp.f32 %v172_v47 }
 0x5ed   :  { %v1437_v6 = vadd.f32 %v1436_v63, %v1435_v52  ;;  %2197 = vpow2.f32 %v681_v23 }
 0x5ef   :  { %v218_v59 = vpop.xlane.xlu1 %217  ;;  %v1438_v18 = vrot.slane %v1437_v6, 2 }
 0x5f1   :  { %v1439_v25 = vadd.f32 %v1438_v18, %v1437_v6 }
 0x5f3   :  { %v1440_v30 = vrot.slane %v1439_v25, 1 }
 0x5f5   :  { %v1441_v35 = vadd.f32 %v1440_v30, %v1439_v25 }
 0x5f6   :  { %v2196_v48 = vpop.eup %2195 }
 0x5f7   :  { %v174_v49 = vmul.f32 %v2196_v48, %v172_v47  ;;  %v1442_v40 = vsub.f32 %v1429_v29, %v1441_v35  ;;  %v466_v29 = vrot.slane %v455_v60, %v2576_v34  ;;  %v1189_v60 = vmul.f32 1.442695, %v2563_v24 }
 0x5f9   :  { %v175_v50 = vsub.f32 2.0, %v174_v49  ;;  %v935_v49 = vmul.f32 1.442695, %v2532_v36  ;;  %v1443_v32 = vmul.f32 1.442695, %v1442_v40 }
 0x5fb   :  { %v176_v51 = vmul.f32 %v2196_v48, %v175_v50  ;;  %2199 = vpow2.f32 %v935_v49 }
 0x5fc   :  { %2201 = vpow2.f32 %v1443_v32 }
 0x5fd   :  { %v177_v53 = vmul.f32 %v176_v51, %v172_v47 }
 0x5ff   :  { %v178_v54 = vsub.f32 2.0, %v177_v53 }
 0x601   :  { %v2590_v57 = vmul.f32 %v178_v54, %v176_v51  ;;  %v473_v51 = vmul.f32 %v466_v29, %v2424_v9 }
 0x603   :  { %v227_v58 = vrot.slane %v2590_v57, %v2588_v55 }
 0x605   :  { %v2594_v61 = vmul.f32 %v227_v58, %v218_v59 }
 0x618   :  { %v1669_v11 = vpop.f32.mrb[12].mxu0  ;;  %v1851_v12 = vpop.f32.mrb[12].mxu1 }
 0x619   :  { %v1673_v13 = vsub.f32 %v1669_v11, %v1602_v7  ;;  %v2598_v14 = vadd.f32 %v1851_v12, %v1784_v27  ;;  %v2169_v2 = vpop.f32.mrb[13].mxu1  ;;  %v2164_v16 = vpop.f32.mrb[13].mxu0 }
 0x61b   :  { %v1674_v20 = vmul.f32 %v1673_v13, %v1673_v13  ;;  %2171 = vmatpush3.msra.mxu0 %v2598_v14 }
 0x61c   :  { %2173 = vmatmul.mubr.msk.f32.vlgmr.msra.gmra.mrb[14].mxu0 %vm67_vm1, %v2410_v3  ;;  %v2198_v3 = vpop.eup %2197 }
 0x61d   :  { %v1675_v21 = vsel %vm143_vm2, %v1674_v20, 0.0  ;;  %v683_v47 = vmul.f32 %v2198_v3, %v2442_v17  ;;  %v2200_v52 = vpop.eup %2199 }
 0x61e   :  { %v1676_v26 = vrot.slane %v1675_v21, 4  ;;  %v937_v63 = vmul.f32 %v2200_v52, %v2442_v17  ;;  %v2202_v5 = vpop.eup %2201 }
 0x61f   :  { %v701_v50 = vrot.slane %v683_v47, %v2558_v15  ;;  %v684_v36 = vsel %vm154_vm3, %v683_v47, 0.0  ;;  %v1445_v6 = vmul.f32 %v2202_v5, %v2442_v17 }
 0x620   :  { %v1677_v28 = vadd.f32 %v1676_v26, %v1675_v21  ;;  %v938_v27 = vsel %vm154_vm3, %v937_v63, 0.0  ;;  %v955_v46 = vrot.slane %v937_v63, %v2558_v15 }
 0x621   :  { %v702_v53 = vcombine.high %v701_v50, %v701_v50  ;;  %v709_v54 = vrot.slane %v701_v50, %v2558_v15  ;;  %v1446_v7 = vsel %vm154_vm3, %v1445_v6, 0.0  ;;  %v1463_v24 = vrot.slane %v1445_v6, %v2558_v15 }
 0x622   :  { %v1678_v31 = vrot.slane %v1677_v28, 2  ;;  %v956_v29 = vcombine.high %v955_v46, %v955_v46  ;;  %v963_v49 = vrot.slane %v955_v46, %v2558_v15 }
 0x623   :  { %v720_v58 = vrot.slane %v709_v54, %v2576_v34  ;;  %v716_v59 = vrot.slane %v702_v53, %v2558_v15 }
 0x624   :  { %v1679_v33 = vadd.f32 %v1678_v31, %v1677_v28  ;;  %v1856_v31 = vld [vmem:[#allocation2 + $0x1c] sm:$0xf]  ;;  %v970_v32 = vrot.slane %v956_v29, %v2558_v15 }
 0x625   :  { %v727_v1 = vmul.f32 %v720_v58, %v2451_v39  ;;  %v724_v62 = vrot.slane %v716_v59, %v2576_v34 }
 0x626   :  { %v1680_v37 = vrot.slane %v1679_v33, 1  ;;  %v978_v58 = vrot.slane %v970_v32, %v2576_v34 }
 0x627   :  { %v728_v9 = vmul.f32 %v724_v62, %v2451_v39  ;;  %v1471_v62 = vrot.slane %v1463_v24, %v2558_v15 }
 0x628   :  { %v1681_v38 = vadd.f32 %v1680_v37, %v1679_v33 }
 0x629   :  { %v1482_v63 = vrot.slane %v1471_v62, %v2576_v34 }
 0x62a   :  { %v1682_v41 = vmul.f32 -3.125, %v1681_v38 }
 0x62b   :  { %v1489_v6 = vmul.f32 %v1482_v63, %v2517_v19 }
 0x62c   :  { %v1683_v43 = vadd.f32 %v1682_v41, %v1442_v40 }
 0x62e   :  { %v1684_v45 = vadd.f32 %v1683_v43, %v2445_v22 }
 0x630   :  { %v1685_v48 = vsel %vm154_vm3, %v1684_v45, -inf }
 0x631   :  { %1686 = vmax.xlane.f32.xlu0 %v1685_v48 }
 0x635   :  { %215 = vadd.xlane.f32.xlu0 %v213_v0 }
 0x639   :  { %475 = vadd.xlane.f32.xlu0 %v473_v51  ;;  %v974_v51 = vrot.slane %v963_v49, %v2576_v34 }
 0x63b   :  { %v981_v54 = vmul.f32 %v974_v51, %v2473_v10 }
 0x63d   :  { %685 = vadd.xlane.f32.xlu0 %v684_v36  ;;  %v1464_v36 = vcombine.high %v1463_v24, %v1463_v24 }
 0x63f   :  { %v1478_v5 = vrot.slane %v1464_v36, %v2558_v15 }
 0x641   :  { %729 = vadd.xlane.f32.xlu0 %v727_v1 }
 0x645   :  { %731 = vadd.xlane.f32.xlu0 %v728_v9 }
 0x649   :  { %939 = vadd.xlane.f32.xlu0 %v938_v27 }
 0x64d   :  { %1447 = vadd.xlane.f32.xlu0 %v1446_v7  ;;  %v1486_v7 = vrot.slane %v1478_v5, %v2576_v34 }
 0x6be   :  { %v1687_v11 = vpop.xlane.xlu0 %1686 }
 0x6bf   :  { %v1688_v12 = vmul.f32 %v1687_v11, %v2442_v17  ;;  %v1490_v11 = vmul.f32 %v1486_v7, %v2517_v19 }
 0x6c1   :  { %v1689_v13 = vsel %vm154_vm3, %v1688_v12, 0.0 }
 0x6c2   :  { %v1690_v2 = vrot.slane %v1689_v13, 4 }
 0x6c4   :  { %v1691_v16 = vadd.f32 %v1690_v2, %v1689_v13  ;;  %v2327_v2 = vmov 0  }
 0x6c5   :  { %2190 = vset.pattern.permute.xlu1 %v2327_v2  ;;  %2189 = vset.pattern.permute.xlu0 %v2327_v2 }
 0x6c6   :  { %v1692_v39 = vrot.slane %v1691_v16, 2 }
 0x6c8   :  { %v1693_v18 = vadd.f32 %v1692_v39, %v1691_v16  ;;  %v432_v16 = vpop.xlane.xlu1 %431 }
 0x6ca   :  { %v1694_v20 = vrot.slane %v1693_v18, 1 }
 0x6cc   :  { %v1695_v21 = vadd.f32 %v1694_v20, %v1693_v18  ;;  %v2661_v39 = vpop.xlane.xlu1 %477  ;;  %v2663_v18 = vpop.xlane.xlu0 %215 }
 0x6ce   :  { %v1696_v23 = vsub.f32 %v1683_v43, %v1695_v21 }
 0x6d0   :  { %v1697_v25 = vmul.f32 1.442695, %v1696_v23 }
 0x6d2   :  { %2203 = vpow2.f32 %v1697_v25  ;;  %v2667_v25 = vpop.xlane.xlu0 %475 }
 0x6d3   :  { %2205 = vpow2.f32 %v1189_v60 }
 0x6dc   :  { %v2204_v26 = vpop.eup %2203 }
 0x6dd   :  { %v1699_v28 = vmul.f32 %v2204_v26, %v2442_v17  ;;  %v2206_v59 = vpop.eup %2205 }
 0x6de   :  { %v1191_v52 = vmul.f32 %v2206_v59, %v2442_v17 }
 0x6df   :  { %v1700_v30 = vsel %vm154_vm3, %v1699_v28, 0.0  ;;  %v2645_v1 = vrot.slane %v1699_v28, %v2558_v15 }
 0x6e0   :  { %1701 = vadd.xlane.f32.xlu0 %v1700_v30  ;;  %v1192_v27 = vsel %vm154_vm3, %v1191_v52, 0.0 }
 0x6e1   :  { %v1718_v9 = vcombine.high %v2645_v1, %v2645_v1 }
 0x6ef   :  { %v1923_v33 = vpop.f32.mrb[14].mxu0 }
 0x6f0   :  { %v1927_v35 = vsub.f32 %v1923_v33, %v1856_v31  ;;  %v2174_v37 = vpop.f32.mrb[15].mxu0  ;;  %v686_v31 = vpop.xlane.xlu0 %685 }
 0x6f2   :  { %v1928_v38 = vmul.f32 %v1927_v35, %v1927_v35 }
 0x6f4   :  { %v1929_v40 = vsel %vm143_vm2, %v1928_v38, 0.0  ;;  %v2669_v38 = vpop.xlane.xlu0 %729 }
 0x6f5   :  { %v1930_v41 = vrot.slane %v1929_v40, 4 }
 0x6f7   :  { %v1931_v42 = vadd.f32 %v1930_v41, %v1929_v40 }
 0x6f8   :  { %v2671_v41 = vpop.xlane.xlu0 %731 }
 0x6f9   :  { %v1932_v3 = vrot.slane %v1931_v42, 2 }
 0x6fb   :  { %v1933_v45 = vadd.f32 %v1932_v3, %v1931_v42  ;;  %v1209_v42 = vrot.slane %v1191_v52, %v2558_v15 }
 0x6fc   :  { %v940_v60 = vpop.xlane.xlu0 %939 }
 0x6fd   :  { %v1934_v43 = vrot.slane %v1933_v45, 1  ;;  %v1210_v3 = vcombine.high %v1209_v42, %v1209_v42 }
 0x6ff   :  { %v1935_v47 = vadd.f32 %v1934_v43, %v1933_v45  ;;  %v1217_v45 = vrot.slane %v1209_v42, %v2558_v15 }
 0x701   :  { %v1936_v48 = vmul.f32 -3.125, %v1935_v47  ;;  %v1228_v47 = vrot.slane %v1217_v45, %v2576_v34 }
 0x703   :  { %v1937_v0 = vadd.f32 %v1936_v48, %v1696_v23  ;;  %v1224_v48 = vrot.slane %v1210_v3, %v2558_v15  ;;  %v1235_v32 = vmul.f32 %v1228_v47, %v2495_v44 }
 0x705   :  { %v1938_v50 = vadd.f32 %v1937_v0, %v2445_v22  ;;  %v982_v22 = vmul.f32 %v978_v58, %v2473_v10  ;;  %v1732_v10 = vrot.slane %v1718_v9, %v2558_v15 }
 0x707   :  { %v1939_v53 = vsel %vm154_vm3, %v1938_v50, -inf  ;;  %v1740_v12 = vrot.slane %v1732_v10, %v2576_v34 }
 0x708   :  { %1940 = vmax.xlane.f32.xlu1 %v1939_v53  ;;  %v1232_v53 = vrot.slane %v1224_v48, %v2576_v34 }
 0x709   :  { %v1744_v13 = vmul.f32 %v1740_v12, %v2540_v56 }
 0x70a   :  { %v1236_v62 = vmul.f32 %v1232_v53, %v2495_v44 }
 0x70c   :  { %983 = vadd.xlane.f32.xlu1 %v981_v54 }
 0x710   :  { %985 = vadd.xlane.f32.xlu1 %v982_v22 }
 0x714   :  { %1193 = vadd.xlane.f32.xlu1 %v1192_v27 }
 0x718   :  { %1491 = vadd.xlane.f32.xlu1 %v1489_v6 }
 0x71c   :  { %1493 = vadd.xlane.f32.xlu1 %v1490_v11 }
 0x720   :  { %1747 = vadd.xlane.f32.xlu1 %v1744_v13 }
 0x795   :  { %v1941_v20 = vpop.xlane.xlu1 %1940 }
 0x796   :  { %v1942_v21 = vmul.f32 %v1941_v20, %v2442_v17 }
 0x798   :  { %v1943_v23 = vsel %vm154_vm3, %v1942_v21, 0.0 }
 0x799   :  { %v1944_v19 = vrot.slane %v1943_v23, 4 }
 0x79b   :  { %v1945_v26 = vadd.f32 %v1944_v19, %v1943_v23 }
 0x79d   :  { %v1946_v28 = vrot.slane %v1945_v26, 2 }
 0x79f   :  { %v1947_v30 = vadd.f32 %v1946_v28, %v1945_v26  ;;  %v223_v28 = vrot.slane %v2590_v57, %v2576_v34 }
 0x7a1   :  { %v1948_v33 = vrot.slane %v1947_v30, 1 }
 0x7a3   :  { %v1949_v35 = vadd.f32 %v1948_v33, %v1947_v30  ;;  %v230_v30 = vmul.f32 %v223_v28, %v2663_v18 }
 0x7a5   :  { %v1950_v37 = vsub.f32 %v1937_v0, %v1949_v35  ;;  %v984_v35 = vpop.xlane.xlu1 %983 }
 0x7a7   :  { %v1951_v40 = vmul.f32 1.442695, %v1950_v37 }
 0x7a9   :  { %2207 = vpow2.f32 %v1951_v40 }
 0x7aa   :  { %2209 = vrcp.f32 %v432_v16 }
 0x7ab   :  { %2211 = vrcp.f32 %v686_v31 }
 0x7ac   :  { %2213 = vrcp.f32 %v940_v60 }
 0x7b3   :  { %v2208_v43 = vpop.eup %2207 }
 0x7b4   :  { %v1953_v46 = vmul.f32 %v2208_v43, %v2442_v17  ;;  %v2210_v0 = vpop.eup %2209  ;;  %v1725_v17 = vrot.slane %v2645_v1, %v2558_v15  ;;  %v1448_v43 = vpop.xlane.xlu0 %1447 }
 0x7b5   :  { %v434_v58 = vmul.f32 %v2210_v0, %v432_v16  ;;  %v2212_v59 = vpop.eup %2211 }
 0x7b6   :  { %v1954_v29 = vsel %vm154_vm3, %v1953_v46, 0.0  ;;  %v1971_v49 = vrot.slane %v1953_v46, %v2558_v15  ;;  %v1736_v52 = vrot.slane %v1725_v17, %v2576_v34  ;;  %v688_v63 = vmul.f32 %v2212_v59, %v686_v31  ;;  %v2214_v1 = vpop.eup %2213 }
 0x7b7   :  { %1955 = vadd.xlane.f32.xlu0 %v1954_v29  ;;  %v435_v9 = vsub.f32 2.0, %v434_v58  ;;  %v942_v7 = vmul.f32 %v2214_v1, %v940_v60 }
 0x7b8   :  { %v1972_v50 = vcombine.high %v1971_v49, %v1971_v49  ;;  %v1979_v51 = vrot.slane %v1971_v49, %v2558_v15  ;;  %v689_v6 = vsub.f32 2.0, %v688_v63 }
 0x7b9   :  { %v436_v27 = vmul.f32 %v2210_v0, %v435_v9  ;;  %v943_v12 = vsub.f32 2.0, %v942_v7 }
 0x7ba   :  { %v1990_v24 = vrot.slane %v1979_v51, %v2576_v34  ;;  %v1986_v54 = vrot.slane %v1972_v50, %v2558_v15  ;;  %v1743_v15 = vmul.f32 %v1736_v52, %v2540_v56  ;;  %v690_v11 = vmul.f32 %v2212_v59, %v689_v6 }
 0x7bb   :  { %1237 = vadd.xlane.f32.xlu0 %v1235_v32  ;;  %v437_v10 = vmul.f32 %v436_v27, %v432_v16  ;;  %v944_v2 = vmul.f32 %v2214_v1, %v943_v12 }
 0x7bc   :  { %v1997_v36 = vmul.f32 %v1990_v24, %v2598_v14  ;;  %v1994_v22 = vrot.slane %v1986_v54, %v2576_v34  ;;  %v691_v13 = vmul.f32 %v690_v11, %v686_v31 }
 0x7bd   :  { %v438_v44 = vsub.f32 2.0, %v437_v10  ;;  %v945_v23 = vmul.f32 %v944_v2, %v940_v60 }
 0x7be   :  { %1999 = vadd.xlane.f32.xlu1 %v1997_v36  ;;  %v1998_v5 = vmul.f32 %v1994_v22, %v2598_v14  ;;  %v692_v21 = vsub.f32 2.0, %v691_v13 }
 0x7bf   :  { %1239 = vadd.xlane.f32.xlu0 %v1236_v62  ;;  %v439_v20 = vmul.f32 %v438_v44, %v436_v27  ;;  %v946_v14 = vsub.f32 2.0, %v945_v23 }
 0x7c0   :  { %v693_v26 = vmul.f32 %v692_v21, %v690_v11 }
 0x7c1   :  { %v483_v19 = vrot.slane %v439_v20, %v2576_v34  ;;  %v487_v56 = vrot.slane %v439_v20, %v2588_v55  ;;  %v947_v33 = vmul.f32 %v946_v14, %v944_v2 }
 0x7c2   :  { %2001 = vadd.xlane.f32.xlu1 %v1998_v5  ;;  %v737_v31 = vrot.slane %v693_v26, %v2576_v34 }
 0x7c3   :  { %1745 = vadd.xlane.f32.xlu0 %v1743_v15  ;;  %v490_v16 = vmul.f32 %v483_v19, %v2667_v25  ;;  %v491_v37 = vmul.f32 %v487_v56, %v2661_v39  ;;  %v991_v42 = vrot.slane %v947_v33, %v2576_v34  ;;  %v986_v25 = vpop.xlane.xlu1 %985  ;;  %v995_v3 = vrot.slane %v947_v33, %v2588_v55 }
 0x7c4   :  { %v744_v40 = vmul.f32 %v737_v31, %v2669_v38  ;;  %v1702_v38 = vpop.xlane.xlu0 %1701 }
 0x7c5   :  { %v998_v57 = vmul.f32 %v991_v42, %v984_v35  ;;  %v999_v45 = vmul.f32 %v995_v3, %v986_v25 }
 0x7c7   :  { %v1194_v39 = vpop.xlane.xlu1 %1193 }
 0x7c8   :  { %2215 = vrcp.f32 %v1194_v39 }
 0x7c9   :  { %2217 = vrcp.f32 %v1448_v43 }
 0x7ca   :  { %2219 = vrcp.f32 %v1702_v38 }
 0x7cb   :  { %v1492_v53 = vpop.xlane.xlu1 %1491 }
 0x7cf   :  { %v1494_v58 = vpop.xlane.xlu1 %1493 }
 0x7d2   :  { %v2216_v60 = vpop.eup %2215 }
 0x7d3   :  { %238 = vperm.xlu1 %2190, %v2594_v61   ;;  %v741_v61 = vrot.slane %v693_v26, %v2588_v55  ;;  %v1196_v46 = vmul.f32 %v2216_v60, %v1194_v39  ;;  %v2218_v47 = vpop.eup %2217  ;;  %v1748_v63 = vpop.xlane.xlu1 %1747  ;;  %v241_v26 = vand.u32 127, %v184_v4 }
 0x7d4   :  { %v1450_v48 = vmul.f32 %v2218_v47, %v1448_v43 }
 0x7d5   :  { %v745_v18 = vmul.f32 %v741_v61, %v2671_v41  ;;  %v1197_v29 = vsub.f32 2.0, %v1196_v46  ;;  %v2220_v41 = vpop.eup %2219  ;;  %v2714_v33 = vsub.s32 %v241_v26, %v2554_v8 }
 0x7d6   :  { %v1451_v49 = vsub.f32 2.0, %v1450_v48  ;;  %v1704_v51 = vmul.f32 %v2220_v41, %v1702_v38 }
 0x7d7   :  { %495 = vperm.xlu1 %2190, %v490_v16   ;;  %v1198_v0 = vmul.f32 %v2216_v60, %v1197_v29 }
 0x7d8   :  { %v1452_v50 = vmul.f32 %v2218_v47, %v1451_v49  ;;  %v1705_v24 = vsub.f32 2.0, %v1704_v51 }
 0x7d9   :  { %235 = vperm.xlu0 %2189, %v230_v30   ;;  %v1199_v32 = vmul.f32 %v1198_v0, %v1194_v39 }
 0x7da   :  { %v1453_v17 = vmul.f32 %v1452_v50, %v1448_v43  ;;  %v1706_v36 = vmul.f32 %v2220_v41, %v1705_v24 }
 0x7db   :  { %498 = vperm.xlu1 %2190, %v491_v37   ;;  %v1200_v54 = vsub.f32 2.0, %v1199_v32 }
 0x7dc   :  { %v1454_v59 = vsub.f32 2.0, %v1453_v17  ;;  %v1707_v52 = vmul.f32 %v1706_v36, %v1702_v38 }
 0x7dd   :  { %749 = vperm.xlu0 %2189, %v744_v40   ;;  %v1201_v22 = vmul.f32 %v1200_v54, %v1198_v0 }
 0x7de   :  { %v1455_v9 = vmul.f32 %v1454_v59, %v1452_v50  ;;  %v1708_v27 = vsub.f32 2.0, %v1707_v52 }
 0x7df   :  { %1003 = vperm.xlu1 %2190, %v998_v57   ;;  %v1245_v1 = vrot.slane %v1201_v22, %v2576_v34  ;;  %v1249_v10 = vrot.slane %v1201_v22, %v2588_v55 }
 0x7e0   :  { %v1503_v6 = vrot.slane %v1455_v9, %v2588_v55  ;;  %v1499_v2 = vrot.slane %v1455_v9, %v2576_v34  ;;  %v1709_v20 = vmul.f32 %v1708_v27, %v1706_v36 }
 0x7e1   :  { %752 = vperm.xlu0 %2189, %v745_v18  }
 0x7e2   :  { %v1507_v12 = vmul.f32 %v1503_v6, %v1494_v58  ;;  %v1506_v19 = vmul.f32 %v1499_v2, %v1492_v53  ;;  %v1753_v28 = vrot.slane %v1709_v20, %v2576_v34  ;;  %v1757_v37 = vrot.slane %v1709_v20, %v2588_v55 }
 0x7e3   :  { %1006 = vperm.xlu1 %2190, %v999_v45  }
 0x7e4   :  { %v1761_v4 = vmul.f32 %v1757_v37, %v1748_v63 }
 0x844   :  { %v1956_v62 = vpop.xlane.xlu0 %1955 }
 0x845   :  { %2221 = vrcp.f32 %v1956_v62 }
 0x848   :  { %v1238_v5 = vpop.xlane.xlu0 %1237 }
 0x849   :  { %v1252_v15 = vmul.f32 %v1245_v1, %v1238_v5 }
 0x84b   :  { %1257 = vperm.xlu0 %2189, %v1252_v15   ;;  %v2000_v7 = vpop.xlane.xlu1 %1999 }
 0x84c   :  { %v1240_v11 = vpop.xlane.xlu0 %1239 }
 0x84d   :  { %v1253_v44 = vmul.f32 %v1249_v10, %v1240_v11 }
 0x84f   :  { %v2222_v13 = vpop.eup %2221  ;;  %1260 = vperm.xlu1 %2190, %v1253_v44   ;;  %1514 = vperm.xlu0 %2189, %v1507_v12   ;;  %v2002_v21 = vpop.xlane.xlu1 %2001 }
 0x850   :  { %v1958_v23 = vmul.f32 %v2222_v13, %v1956_v62  ;;  %v1746_v56 = vpop.xlane.xlu0 %1745 }
 0x851   :  { %v1760_v31 = vmul.f32 %v1753_v28, %v1746_v56 }
 0x852   :  { %v1959_v14 = vsub.f32 2.0, %v1958_v23 }
 0x853   :  { %1511 = vperm.xlu1 %2190, %v1506_v19   ;;  %v239_v16 = vpop.permute.xlu1 %238 }
 0x854   :  { %v1960_v30 = vmul.f32 %v2222_v13, %v1959_v14  ;;  %v249_v57 = vrot.slane %v239_v16, %v2714_v33 }
 0x856   :  { %v1961_v35 = vmul.f32 %v1960_v30, %v1956_v62 }
 0x857   :  { %1765 = vperm.xlu1 %2190, %v1760_v31   ;;  %v496_v40 = vpop.permute.xlu1 %495 }
 0x858   :  { %v1962_v61 = vsub.f32 2.0, %v1961_v35  ;;  %v236_v42 = vpop.permute.xlu0 %235  ;;  %v503_v39 = vrot.slane %v496_v40, %v2714_v33 }
 0x859   :  { %v245_v25 = vrot.slane %v236_v42, %v2714_v33 }
 0x85a   :  { %v1963_v18 = vmul.f32 %v1962_v61, %v1960_v30 }
 0x85b   :  { %v251_v3 = vsel %vm250_vm4, %v249_v57, %v245_v25  ;;  %1768 = vperm.xlu1 %2190, %v1761_v4   ;;  %v499_v8 = vpop.permute.xlu1 %498 }
 0x85c   :  { %v2007_v45 = vrot.slane %v1963_v18, %v2576_v34  ;;  %254 = vst.msk [vmem:[#allocation8] sm:$0x3] %vm253_vm5, %v251_v3  ;;  %v507_v43 = vrot.slane %v499_v8, %v2714_v33  ;;  %v750_v38 = vpop.permute.xlu0 %749  ;;  %v2011_v46 = vrot.slane %v1963_v18, %v2588_v55 }
 0x85d   :  { %v757_v49 = vrot.slane %v750_v38, %v2714_v33 }
 0x85e   :  { %v2014_v60 = vmul.f32 %v2007_v45, %v2000_v7  ;;  %v508_v47 = vsel %vm250_vm4, %v507_v43, %v503_v39  ;;  %v2015_v0 = vmul.f32 %v2011_v46, %v2002_v21 }
 0x85f   :  { %511 = vst.msk [vmem:[#allocation8 + $0x2] sm:$0x3] %vm253_vm5, %v508_v47  ;;  %v1004_v48 = vpop.permute.xlu1 %1003 }
 0x860   :  { %v753_v29 = vpop.permute.xlu0 %752  ;;  %2019 = vperm.xlu1 %2190, %v2014_v60   ;;  %v1011_v51 = vrot.slane %v1004_v48, %v2714_v33 }
 0x861   :  { %v761_v34 = vrot.slane %v753_v29, %v2714_v33 }
 0x863   :  { %v762_v41 = vsel %vm250_vm4, %v761_v34, %v757_v49  ;;  %v1007_v50 = vpop.permute.xlu1 %1006 }
 0x864   :  { %765 = vst.msk [vmem:[#allocation8 + $0x4] sm:$0x3] %vm253_vm5, %v762_v41  ;;  %v1015_v55 = vrot.slane %v1007_v50, %v2714_v33  ;;  %2022 = vperm.xlu1 %2190, %v2015_v0  }
 0x866   :  { %v1016_v32 = vsel %vm250_vm4, %v1015_v55, %v1011_v51 }
 0x867   :  { %1019 = vst.msk [vmem:[#allocation8 + $0x6] sm:$0x3] %vm253_vm5, %v1016_v32 }
 0x8ca   :  { %v1258_v53 = vpop.permute.xlu0 %1257 }
 0x8cb   :  { %v1265_v24 = vrot.slane %v1258_v53, %v2714_v33 }
 0x8ce   :  { %v1261_v17 = vpop.permute.xlu1 %1260  ;;  %v1515_v58 = vpop.permute.xlu0 %1514 }
 0x8cf   :  { %v1269_v54 = vrot.slane %v1261_v17, %v2714_v33  ;;  %v1523_v22 = vrot.slane %v1515_v58, %v2714_v33 }
 0x8d1   :  { %v1270_v59 = vsel %vm250_vm4, %v1269_v54, %v1265_v24 }
 0x8d2   :  { %1273 = vst.msk [vmem:[#allocation8 + $0x8] sm:$0x3] %vm253_vm5, %v1270_v59  ;;  %v1512_v36 = vpop.permute.xlu1 %1511 }
 0x8d3   :  { %v1519_v62 = vrot.slane %v1512_v36, %v2714_v33 }
 0x8d5   :  { %v1524_v52 = vsel %vm250_vm4, %v1523_v22, %v1519_v62 }
 0x8d6   :  { %1527 = vst.msk [vmem:[#allocation8 + $0xa] sm:$0x3] %vm253_vm5, %v1524_v52  ;;  %v1766_v9 = vpop.permute.xlu1 %1765 }
 0x8d7   :  { %v1773_v1 = vrot.slane %v1766_v9, %v2714_v33 }
 0x8da   :  { %v1769_v63 = vpop.permute.xlu1 %1768 }
 0x8db   :  { %v1777_v5 = vrot.slane %v1769_v63, %v2714_v33 }
 0x8dd   :  { %v1778_v15 = vsel %vm250_vm4, %v1777_v5, %v1773_v1 }
 0x8de   :  { %1781 = vst.msk [vmem:[#allocation8 + $0xc] sm:$0x3] %vm253_vm5, %v1778_v15 }
 0x8df   :  { %v2020_v27 = vpop.permute.xlu1 %2019 }
 0x8e0   :  { %v2027_v7 = vrot.slane %v2020_v27, %v2714_v33 }
 0x8e3   :  { %v2023_v6 = vpop.permute.xlu1 %2022 }
 0x8e4   :  { %v2031_v10 = vrot.slane %v2023_v6, %v2714_v33 }
 0x8e6   :  { %v2032_v11 = vsel %vm250_vm4, %v2031_v10, %v2027_v7 }
 0x8e7   :  { %2035 = vst.msk [vmem:[#allocation8 + $0xe] sm:$0x3] %vm253_vm5, %v2032_v11 }
 0x8e8   :  { %2300 = shalt.err (!%p2297_p0)
}
 0x8e9   :  { %s2301_s12 = scalar_lea.hbm %s2768_s5, 256 }
 0x8ea   :  { %p2302_p1 = scmp.ne.s32.totalorder %s2768_s5, %s2301_s12  ;;  %p2305_p2 = scmp.lt.u32.totalorder %s2301_s12, %s2768_s5 }
 0x8ec   :  { %p2307_p3 = pnand %p2305_p2, %p2302_p1 }
 0x8ee   :  { %2310 = shalt.err (!%p2307_p3)
}
 0x8ef   :  { %s2329_s1 = smov 32   ;;  %s2330_s17 = smov 2  }
 0x8f0   :  { %2047 = dma.vmem_to_hbm [thread:$0]  %s2042_s8, 256, %s2768_s5, [#allocation4], %s2329_s1, %s2329_s1, %s2330_s17  }
 0x8f1   :  { %2315 = dma.done.wait [#allocation4], 256  }
 0x8f2   :  { %2316 = vsyncadd [#allocation4], 4294967040 }
 0x8f3   :  { %2051 = vsyncpa [#allocation3], 1 }
 0x8f4   :  { %2052 = vsyncpa [#allocation6], 1 }
 0x8f5   :  { %2053 = vsyncpa [#allocation4], 1 }

</bundles_post_ra>
